<compile_context>
chip_gen: v5e
topology: v5e:2x2
jax: 0.10.0
libtpu: 0.0.40
codegen_flags: <defaults>
</compile_context>

<pallas_src>
import functools

import jax
import jax.numpy as jnp
from jax.experimental import pallas as pl
from jax.experimental.pallas import tpu as pltpu


def _round_up(a, m):
    return ((a + m - 1) // m) * m


def _mutual_kernel(a_ref, xi_ref, xjt_ref, xj_ref, o_ref, *,
                   b, inv_k, inv_c, d, e, h, dim):
    """One (row-tile i, col-tile j) grid step.

    a_ref   : (tm, tj)   tile of the adjacency matrix A
    xi_ref  : (tm, dim)  row tile of x (the "i" states)
    xjt_ref : (dim, tj)  column tile of x^T (j on lanes -> lane-dense denominator)
    xj_ref  : (tj, dim)  row tile of x over j (MXU matvec RHS, no in-kernel transpose)
    o_ref   : (tm, dim)  output tile, resident across the j axis (accumulator)
    """
    a = a_ref[...].astype(jnp.float32)      # upcast is a no-op for f32 A, cheap for bf16 A
    xi = xi_ref[...]
    xjt = xjt_ref[...]
    xj = xj_ref[...]

    # Self term  b + x(1 - x/k)(x/c - 1): written once per row tile (first j step).
    @pl.when(pl.program_id(1) == 0)
    def _():
        o_ref[...] = b + xi * (1.0 - xi * inv_k) * (xi * inv_c - 1.0)

    # Small-shape denominator precursor, hoisted out of the (tm, tj) slab math.
    dex = d + e * xi                                      # (tm, dim)

    # Coupling term; dim is small and static, so this Python loop unrolls at trace time.
    coup = None                                           # (tm, dim) accumulator (values)
    for f in range(dim):
        dex_f = dex[:, f:f + 1]                           # (tm, 1)
        hx_f = h * xjt[f:f + 1, :]                        # (1, tj)   small-shape mul
        den = dex_f + hx_f                                # (tm, tj)  ONE full-slab broadcast add
        # EUP reciprocal (free VLIW slot) + one Newton step -> ~f32-exact 1/den.
        r = pl.reciprocal(den, approx=True)
        r = r * (2.0 - den * r)
        m = a * r                                         # (tm, tj)  ONE full-slab mul
        # One-hot mask selects feature column f of x_j; dot() then does the x_j multiply
        # AND the j-reduction on the otherwise-idle MXU (no XLU lane reduce).
        onehot = (jax.lax.broadcasted_iota(jnp.int32, (1, dim), 1) == f).astype(jnp.float32)
        term = jnp.dot(m, xj * onehot, preferred_element_type=jnp.float32)   # (tm, dim)
        coup = term if coup is None else coup + term
    o_ref[...] += xi * coup                               # single small (tm, dim) update


def mutual_dynamics(A, x, b=0.1, k=5.0, c=1.0, d=5.0, e=0.9, h=0.1,
                    *, tm=None, tj=None, a_dtype=jnp.float32):
    """Computes MutualDynamics.forward(t, x) for dense A (t is unused / autonomous).

    a_dtype=jnp.bfloat16 halves A's HBM traffic (useful on v5e/v6e at large n);
    arithmetic stays f32 in-kernel.
    """
    x = x.astype(jnp.float32)
    A = A.astype(a_dtype)
    n, n2 = A.shape
    assert n == n2, "A must be square"
    nx, dim = x.shape
    assert nx == n, "x rows must match A"

    # Pad the node axis so tiles meet the (8, 128) layout constraint; arbitrary n works.
    n_pad = _round_up(n, 128)
    if tj is None:                       # j tile: lane axis, multiple of 128
        tj = min(1024, n_pad)
        while n_pad % tj:
            tj -= 128
    if tm is None:                       # i tile: sublane axis, multiple of 8
        # Cap at n_pad//2 so the "parallel" row axis has >= 2 tiles (both v7x TCs get
        # work); cap at 512 to keep VMEM comfortable on v7x (64 MiB physical).
        tm = min(512, max(8, (n_pad // 2) // 8 * 8))
        while n_pad % tm:
            tm -= 8
    assert tm % 8 == 0 and tj % 128 == 0
    assert n_pad % tm == 0 and n_pad % tj == 0

    pad = n_pad - n
    if pad:
        A = jnp.pad(A, ((0, pad), (0, pad)))                       # zero coupling weights
        x = jnp.pad(x, ((0, pad), (0, 0)), constant_values=1.0)    # keep den away from 0
    xt = x.T                                                       # (dim, n_pad): j on lanes

    grid = (n_pad // tm, n_pad // tj)

    kernel = functools.partial(
        _mutual_kernel,
        b=float(b), inv_k=1.0 / float(k), inv_c=1.0 / float(c),
        d=float(d), e=float(e), h=float(h), dim=int(dim))

    cost = pl.CostEstimate(
        flops=10 * n_pad * n_pad * dim,
        transcendentals=n_pad * n_pad * dim,              # one EUP reciprocal per (i, j, feat)
        bytes_accessed=n_pad * n_pad * jnp.dtype(a_dtype).itemsize + 4 * n_pad * dim * 4)

    out = pl.pallas_call(
        kernel,
        out_shape=jax.ShapeDtypeStruct((n_pad, dim), jnp.float32),
        grid_spec=pltpu.PrefetchScalarGridSpec(
            num_scalar_prefetch=0,
            grid=grid,
            in_specs=[
                pl.BlockSpec((tm, tj), lambda i, j: (i, j)),     # A tile
                pl.BlockSpec((tm, dim), lambda i, j: (i, 0)),    # x_i rows (full feature dim)
                pl.BlockSpec((dim, tj), lambda i, j: (0, j)),    # x_j^T (denominator, j on lanes)
                pl.BlockSpec((tj, dim), lambda i, j: (j, 0)),    # x_j rows (MXU matvec RHS)
            ],
            out_specs=pl.BlockSpec((tm, dim), lambda i, j: (i, 0)),  # resident accumulator
        ),
        compiler_params=pltpu.CompilerParams(
            dimension_semantics=("parallel", "arbitrary"),
            vmem_limit_bytes=48 * 1024 * 1024,
        ),
        cost_estimate=cost,
    )(A, x, xt, x)

    return out[:n]


def mutual_dynamics_ref(A, x, b=0.1, k=5.0, c=1.0, d=5.0, e=0.9, h=0.1):
    """Pure-JAX reference (vectorized form of the module's dim>1 dense / sparse branches)."""
    A = A.astype(jnp.float32)
    x = x.astype(jnp.float32)
    f = b + x * (1.0 - x / k) * (x / c - 1.0)
    xi = x[:, None, :]                 # (n, 1, dim)
    xj = x[None, :, :]                 # (1, n, dim)
    coup = A[:, :, None] * (xi * xj) / (d + e * xi + h * xj)
    return f + jnp.sum(coup, axis=1)


if __name__ == "__main__":
    key = jax.random.PRNGKey(0)
    ka, kw, kx = jax.random.split(key, 3)

    N = 200    # number of nodes (deliberately NOT a multiple of the tile sizes)
    DIM = 3    # feature dimension per node

    # Random non-negative adjacency, ~50% sparse, zero diagonal.
    mask = (jax.random.uniform(ka, (N, N)) > 0.5).astype(jnp.float32)
    weights = jax.random.uniform(kw, (N, N), dtype=jnp.float32)
    A = mask * weights * (1.0 - jnp.eye(N, dtype=jnp.float32))

    # Positive "abundance" states, as in mutualistic population dynamics.
    x0 = 5.0 * jax.random.uniform(kx, (N, DIM), dtype=jnp.float32) + 0.1

    ref = mutual_dynamics_ref(A, x0)

    # 1) Small explicit tiles: N padded to 256 -> 2x2 grid, exercises padding, the
    #    parallel row axis and the j-reduction accumulator path.
    out = jax.block_until_ready(mutual_dynamics(A, x0, tm=128, tj=128))
    assert out.shape == (N, DIM)
    err = float(jnp.max(jnp.abs(out - ref)))
    assert jnp.allclose(out, ref, atol=1e-3, rtol=1e-3), f"tiled mismatch, max |err|={err}"

    # 2) Default tile selection path.
    out2 = jax.block_until_ready(mutual_dynamics(A, x0))
    err2 = float(jnp.max(jnp.abs(out2 - ref)))
    assert jnp.allclose(out2, ref, atol=1e-3, rtol=1e-3), f"default mismatch, max |err|={err2}"

    print("KERNEL_OK")
</pallas_src>

<mosaic_0001>
module attributes {stable_mosaic.version = 11 : i64} {
  func.func @_mutual_kernel(%arg0: i32, %arg1: i32, %arg2: memref<128x128xf32, #tpu.memory_space<vmem>>, %arg3: memref<128x3xf32, #tpu.memory_space<vmem>>, %arg4: memref<3x128xf32, #tpu.memory_space<vmem>>, %arg5: memref<128x3xf32, #tpu.memory_space<vmem>>, %arg6: memref<128x3xf32, #tpu.memory_space<vmem>>) attributes {dimension_semantics = [#tpu.dimension_semantics<parallel>, #tpu.dimension_semantics<arbitrary>], iteration_bounds = array<i64: 2, 2>, scalar_prefetch = 0 : i64, scratch_operands = 0 : i64, tpu.core_type = #tpu.core_type<tc>, window_params = [{transform_indices = @transform_0, window_bounds = array<i64: 128, 128>}, {transform_indices = @transform_1, window_bounds = array<i64: 128, 3>}, {transform_indices = @transform_2, window_bounds = array<i64: 3, 128>}, {transform_indices = @transform_3, window_bounds = array<i64: 128, 3>}, {transform_indices = @transform_4, window_bounds = array<i64: 128, 3>}]} {
    %c0 = arith.constant 0 : index
    %c0_0 = arith.constant 0 : index
    %0 = vector.load %arg2[%c0, %c0_0] : memref<128x128xf32, #tpu.memory_space<vmem>>, vector<128x128xf32>
    %c0_1 = arith.constant 0 : index
    %c0_2 = arith.constant 0 : index
    %1 = vector.load %arg3[%c0_1, %c0_2] : memref<128x3xf32, #tpu.memory_space<vmem>>, vector<128x3xf32>
    %c0_3 = arith.constant 0 : index
    %c0_4 = arith.constant 0 : index
    %2 = vector.load %arg4[%c0_3, %c0_4] : memref<3x128xf32, #tpu.memory_space<vmem>>, vector<3x128xf32>
    %c0_5 = arith.constant 0 : index
    %c0_6 = arith.constant 0 : index
    %3 = vector.load %arg5[%c0_5, %c0_6] : memref<128x3xf32, #tpu.memory_space<vmem>>, vector<128x3xf32>
    %c0_i32 = arith.constant 0 : i32
    %4 = arith.cmpi eq, %arg1, %c0_i32 : i32
    %5 = arith.extui %4 : i1 to i32
    %c0_i32_7 = arith.constant 0 : i32
    %6 = arith.cmpi ne, %5, %c0_i32_7 : i32
    scf.if %6 {
      %cst_23 = arith.constant 2.000000e-01 : f32
      %80 = vector.broadcast %cst_23 : f32 to vector<128x3xf32>
      %81 = arith.mulf %1, %80 : vector<128x3xf32>
      %cst_24 = arith.constant 1.000000e+00 : f32
      %82 = vector.broadcast %cst_24 : f32 to vector<128x3xf32>
      %83 = arith.subf %82, %81 : vector<128x3xf32>
      %84 = arith.mulf %1, %83 : vector<128x3xf32>
      %cst_25 = arith.constant 1.000000e+00 : f32
      %85 = vector.broadcast %cst_25 : f32 to vector<128x3xf32>
      %86 = arith.mulf %1, %85 : vector<128x3xf32>
      %cst_26 = arith.constant 1.000000e+00 : f32
      %87 = vector.broadcast %cst_26 : f32 to vector<128x3xf32>
      %88 = arith.subf %86, %87 : vector<128x3xf32>
      %89 = arith.mulf %84, %88 : vector<128x3xf32>
      %cst_27 = arith.constant 1.000000e-01 : f32
      %90 = vector.broadcast %cst_27 : f32 to vector<128x3xf32>
      %91 = arith.addf %90, %89 : vector<128x3xf32>
      %c0_28 = arith.constant 0 : index
      %c0_29 = arith.constant 0 : index
      %92 = vector.load %arg6[%c0_28, %c0_29] : memref<128x3xf32, #tpu.memory_space<vmem>>, vector<128x3xf32>
      tpu.vector_store %arg6[%c0_28, %c0_29], %91 {strides = array<i32>} : memref<128x3xf32, #tpu.memory_space<vmem>>, vector<128x3xf32>,
    } else {
    }
    %cst = arith.constant 0.899999976 : f32
    %7 = vector.broadcast %cst : f32 to vector<128x3xf32>
    %8 = arith.mulf %7, %1 : vector<128x3xf32>
    %cst_8 = arith.constant 5.000000e+00 : f32
    %9 = vector.broadcast %cst_8 : f32 to vector<128x3xf32>
    %10 = arith.addf %9, %8 : vector<128x3xf32>
    %11 = vector.extract_strided_slice %10 {offsets = [0, 0], sizes = [128, 1], strides = [1, 1]} : vector<128x3xf32> to vector<128x1xf32>
    %12 = vector.extract_strided_slice %2 {offsets = [0, 0], sizes = [1, 128], strides = [1, 1]} : vector<3x128xf32> to vector<1x128xf32>
    %cst_9 = arith.constant 1.000000e-01 : f32
    %13 = vector.broadcast %cst_9 : f32 to vector<1x128xf32>
    %14 = arith.mulf %13, %12 : vector<1x128xf32>
    %15 = vector.broadcast %11 : vector<128x1xf32> to vector<128x128xf32>
    %16 = vector.broadcast %14 : vector<1x128xf32> to vector<128x128xf32>
    %17 = arith.addf %15, %16 : vector<128x128xf32>
    %18 = tpu.reciprocal %17 {approx = true} : vector<128x128xf32> -> vector<128x128xf32>
    %19 = arith.mulf %17, %18 : vector<128x128xf32>
    %cst_10 = arith.constant 2.000000e+00 : f32
    %20 = vector.broadcast %cst_10 : f32 to vector<128x128xf32>
    %21 = arith.subf %20, %19 : vector<128x128xf32>
    %22 = arith.mulf %18, %21 : vector<128x128xf32>
    %23 = arith.mulf %0, %22 : vector<128x128xf32>
    %24 = tpu.iota {dimensions = array<i32: 1>} : vector<1x3xi32>
    %c0_i32_11 = arith.constant 0 : i32
    %25 = vector.broadcast %c0_i32_11 : i32 to vector<1x3xi32>
    %26 = arith.cmpi eq, %24, %25 : vector<1x3xi32>
    %27 = arith.extui %26 : vector<1x3xi1> to vector<1x3xi32>
    %28 = arith.sitofp %27 : vector<1x3xi32> to vector<1x3xf32>
    %29 = vector.broadcast %28 : vector<1x3xf32> to vector<128x3xf32>
    %30 = arith.mulf %3, %29 : vector<128x3xf32>
    %cst_12 = arith.constant dense<0.000000e+00> : vector<128x3xf32>
    %31 = tpu.matmul %23, %30, %cst_12 {dimension_numbers = #tpu.dot_dimension_numbers<[1], [0], [0], [1], [0, 0, 1, 1], [], []>} : vector<128x128xf32>, vector<128x3xf32>, vector<128x3xf32> -> vector<128x3xf32>
    %32 = vector.extract_strided_slice %10 {offsets = [0, 1], sizes = [128, 1], strides = [1, 1]} : vector<128x3xf32> to vector<128x1xf32>
    %33 = vector.extract_strided_slice %2 {offsets = [1, 0], sizes = [1, 128], strides = [1, 1]} : vector<3x128xf32> to vector<1x128xf32>
    %cst_13 = arith.constant 1.000000e-01 : f32
    %34 = vector.broadcast %cst_13 : f32 to vector<1x128xf32>
    %35 = arith.mulf %34, %33 : vector<1x128xf32>
    %36 = vector.broadcast %32 : vector<128x1xf32> to vector<128x128xf32>
    %37 = vector.broadcast %35 : vector<1x128xf32> to vector<128x128xf32>
    %38 = arith.addf %36, %37 : vector<128x128xf32>
    %39 = tpu.reciprocal %38 {approx = true} : vector<128x128xf32> -> vector<128x128xf32>
    %40 = arith.mulf %38, %39 : vector<128x128xf32>
    %cst_14 = arith.constant 2.000000e+00 : f32
    %41 = vector.broadcast %cst_14 : f32 to vector<128x128xf32>
    %42 = arith.subf %41, %40 : vector<128x128xf32>
    %43 = arith.mulf %39, %42 : vector<128x128xf32>
    %44 = arith.mulf %0, %43 : vector<128x128xf32>
    %45 = tpu.iota {dimensions = array<i32: 1>} : vector<1x3xi32>
    %c1_i32 = arith.constant 1 : i32
    %46 = vector.broadcast %c1_i32 : i32 to vector<1x3xi32>
    %47 = arith.cmpi eq, %45, %46 : vector<1x3xi32>
    %48 = arith.extui %47 : vector<1x3xi1> to vector<1x3xi32>
    %49 = arith.sitofp %48 : vector<1x3xi32> to vector<1x3xf32>
    %50 = vector.broadcast %49 : vector<1x3xf32> to vector<128x3xf32>
    %51 = arith.mulf %3, %50 : vector<128x3xf32>
    %cst_15 = arith.constant dense<0.000000e+00> : vector<128x3xf32>
    %52 = tpu.matmul %44, %51, %cst_15 {dimension_numbers = #tpu.dot_dimension_numbers<[1], [0], [0], [1], [0, 0, 1, 1], [], []>} : vector<128x128xf32>, vector<128x3xf32>, vector<128x3xf32> -> vector<128x3xf32>
    %53 = arith.addf %31, %52 : vector<128x3xf32>
    %54 = vector.extract_strided_slice %10 {offsets = [0, 2], sizes = [128, 1], strides = [1, 1]} : vector<128x3xf32> to vector<128x1xf32>
    %55 = vector.extract_strided_slice %2 {offsets = [2, 0], sizes = [1, 128], strides = [1, 1]} : vector<3x128xf32> to vector<1x128xf32>
    %cst_16 = arith.constant 1.000000e-01 : f32
    %56 = vector.broadcast %cst_16 : f32 to vector<1x128xf32>
    %57 = arith.mulf %56, %55 : vector<1x128xf32>
    %58 = vector.broadcast %54 : vector<128x1xf32> to vector<128x128xf32>
    %59 = vector.broadcast %57 : vector<1x128xf32> to vector<128x128xf32>
    %60 = arith.addf %58, %59 : vector<128x128xf32>
    %61 = tpu.reciprocal %60 {approx = true} : vector<128x128xf32> -> vector<128x128xf32>
    %62 = arith.mulf %60, %61 : vector<128x128xf32>
    %cst_17 = arith.constant 2.000000e+00 : f32
    %63 = vector.broadcast %cst_17 : f32 to vector<128x128xf32>
    %64 = arith.subf %63, %62 : vector<128x128xf32>
    %65 = arith.mulf %61, %64 : vector<128x128xf32>
    %66 = arith.mulf %0, %65 : vector<128x128xf32>
    %67 = tpu.iota {dimensions = array<i32: 1>} : vector<1x3xi32>
    %c2_i32 = arith.constant 2 : i32
    %68 = vector.broadcast %c2_i32 : i32 to vector<1x3xi32>
    %69 = arith.cmpi eq, %67, %68 : vector<1x3xi32>
    %70 = arith.extui %69 : vector<1x3xi1> to vector<1x3xi32>
    %71 = arith.sitofp %70 : vector<1x3xi32> to vector<1x3xf32>
    %72 = vector.broadcast %71 : vector<1x3xf32> to vector<128x3xf32>
    %73 = arith.mulf %3, %72 : vector<128x3xf32>
    %cst_18 = arith.constant dense<0.000000e+00> : vector<128x3xf32>
    %74 = tpu.matmul %66, %73, %cst_18 {dimension_numbers = #tpu.dot_dimension_numbers<[1], [0], [0], [1], [0, 0, 1, 1], [], []>} : vector<128x128xf32>, vector<128x3xf32>, vector<128x3xf32> -> vector<128x3xf32>
    %75 = arith.addf %53, %74 : vector<128x3xf32>
    %c0_19 = arith.constant 0 : index
    %c0_20 = arith.constant 0 : index
    %76 = vector.load %arg6[%c0_19, %c0_20] : memref<128x3xf32, #tpu.memory_space<vmem>>, vector<128x3xf32>
    %77 = arith.mulf %1, %75 : vector<128x3xf32>
    %78 = arith.addf %76, %77 : vector<128x3xf32>
    %c0_21 = arith.constant 0 : index
    %c0_22 = arith.constant 0 : index
    %79 = vector.load %arg6[%c0_21, %c0_22] : memref<128x3xf32, #tpu.memory_space<vmem>>, vector<128x3xf32>
    tpu.vector_store %arg6[%c0_21, %c0_22], %78 {strides = array<i32>} : memref<128x3xf32, #tpu.memory_space<vmem>>, vector<128x3xf32>,
    return
  }
  func.func @transform_0(%arg0: i32, %arg1: i32) -> (i32, i32) {
    %c0_i32 = arith.constant 0 : i32
    return %arg0, %arg1 : i32, i32
  }
  func.func @transform_1(%arg0: i32, %arg1: i32) -> (i32, i32) {
    %c0_i32 = arith.constant 0 : i32
    %c0_i32_0 = arith.constant 0 : i32
    return %arg0, %c0_i32 : i32, i32
  }
  func.func @transform_2(%arg0: i32, %arg1: i32) -> (i32, i32) {
    %c0_i32 = arith.constant 0 : i32
    %c0_i32_0 = arith.constant 0 : i32
    return %c0_i32, %arg1 : i32, i32
  }
  func.func @transform_3(%arg0: i32, %arg1: i32) -> (i32, i32) {
    %c0_i32 = arith.constant 0 : i32
    %c0_i32_0 = arith.constant 0 : i32
    return %arg1, %c0_i32 : i32, i32
  }
  func.func @transform_4(%arg0: i32, %arg1: i32) -> (i32, i32) {
    %c0_i32 = arith.constant 0 : i32
    %c0_i32_0 = arith.constant 0 : i32
    return %arg0, %c0_i32 : i32, i32
  }
}

</mosaic_0001>

<bundles_post_ra>
// kernel: tpu_custom_call.1
= control target key start
LH: loop header
LB: loop body
LE: loop exit
PB: predicated region body
PF: predicated region fallthrough
CT: control target
= control target key end

     0   :  { %s1886_s15 = smov 0   ;;  %s1888_s16 = smov 0   ;;  %s2682_s0 = inlined_call_operand.vmem [shape: f32[256,256], index: 0, kind: input, shape index: {}]   ;;  %s2683_s1 = inlined_call_operand.vmem [shape: f32[256,3], index: 1, kind: input, shape index: {}]   ;;  %s2684_s2 = inlined_call_operand.vmem [shape: f32[3,256], index: 2, kind: input, shape index: {}]   ;;  %s2685_s3 = inlined_call_operand.vmem [shape: f32[256,3], index: 3, kind: input, shape index: {}]   ;;  %s2686_s4 = inlined_call_operand.vmem [shape: f32[256,3], index: 4, kind: output, shape index: {}]  }
   0x1   :  { %s1890_s17 = smov 0   ;;  %s1892_s18 = smov 0  }
   0x2   :  { %s1894_s19 = smov 0   ;;  %s1896_s20 = smov 0  }
   0x3   :  { %s1898_s21 = smov 0  }
   0x4 LB: > { %s23_s22 = sadd.s32 1, %s1847_s19  ;;  %s26_s23 = sadd.s32 1, %s1851_s20  ;;  %s1855_s21 = sphi %s1898_s21, %s14_s21   ;;  %s1851_s20 = sphi %s1896_s20, %s2791_s20   ;;  %s1847_s19 = sphi %s1894_s19, %s2790_s19   ;;  %s1843_s18 = sphi %s1892_s18, %s2789_s18   ;;  %s1839_s17 = sphi %s1890_s17, %s2788_s17   ;;  %s1835_s16 = sphi %s1888_s16, %s2787_s16   ;;  %s1831_s15 = sphi %s1886_s15, %s2786_s15  }
   0x5   : > { %p24_p0 = scmp.ge.s32.totalorder %s23_s22, 2  ;;  %p42_p1 = scmp.ne.s32.totalorder %s1835_s16, %s1831_s15 }
   0x6   : > { %p43_p2 = scmp.eq.s32.totalorder %s1855_s21, 0  ;;  %s35_s27 = sadd.s32 1, %s1835_s16 }
   0x7   : > { %s2793_s22 = smov (%p24_p0, %s23_s22), 0  ;;  %s2795_s23 = smov (!%p24_p0, %s26_s23), %s1851_s20 }
   0x8   : > { %p44_p3 = por %p43_p2, %p42_p1  ;;  %p28_p4 = scmp.ge.s32.totalorder %s2795_s23, 2 }
   0x9   : > { %s31_s24 = ssub.s32 %s1847_s19, %s2793_s22  ;;  %p1521_p6 = scmp.ge.s32.totalorder %s1855_s21, 4 }
   0xa   : > { %s2797_s23 = smov (%p28_p4, %s2795_s23), 0 }
   0xb   : > { %s30_s25 = ssub.s32 %s1851_s20, %s2797_s23  ;;  %172 = sbr.rel (%p1521_p6) target bundleno = 38 (0x26), region = 16 }
   0xc   : > { %s32_s26 = sor.u32 %s31_s24, %s30_s25 }
   0xd   : > { %p33_p5 = scmp.eq.s32.totalorder %s32_s26, 0 }
   0xf   : > { %s1937_s28 = scalar_select %p33_p5, %s1835_s16, %s35_s27  }
  0x10   : > { %175 = sbr.rel (!%p44_p3) target bundleno = 38 (0x26), region = 20  ;;  %s177_s29 = sand.u32 (%p44_p3), 1, %s1835_s16  }
  0x11   : > { %s1557_s30 = sshll.u32 (%p44_p3), %s1851_s20, 5  ;;  %s1522_s5 = sshll.u32 (%p44_p3), %s177_s29, 7 }
  0x12   : > { %s182_s6 = sadd.s32 (%p44_p3), %s1847_s19, %s1557_s30  ;;  %s179_s11 = scalar_lea.vmem (%p44_p3), [#allocation2], %s1522_s5 }
  0x13   : > { %s1525_s7 = sshll.u32 (%p44_p3), %s182_s6, 3 }
  0x14   : > { %s1946_s10 = scalar_lea.vmem (%p44_p3), %s2682_s0, %s1525_s7 }
  0x15   : > { %v243_v0 = vld [vmem:[%s1946_s10] sm:$0xff]  ;;  %v245_v1 = vld [vmem:[%s1946_s10 + $0x10] sm:$0xff] }
  0x16   : > { %v247_v2 = vld [vmem:[%s1946_s10 + $0x20] sm:$0xff]  ;;  %244 = vst [vmem:[%s179_s11] sm:$0xff] %v243_v0  ;;  %v249_v3 = vld [vmem:[%s1946_s10 + $0x30] sm:$0xff] }
  0x17   : > { %246 = vst [vmem:[%s179_s11 + $0x8] sm:$0xff] %v245_v1  ;;  %v251_v4 = vld [vmem:[%s1946_s10 + $0x40] sm:$0xff]  ;;  %v253_v5 = vld [vmem:[%s1946_s10 + $0x50] sm:$0xff] }
  0x18   : > { %248 = vst [vmem:[%s179_s11 + $0x10] sm:$0xff] %v247_v2  ;;  %v255_v6 = vld [vmem:[%s1946_s10 + $0x60] sm:$0xff]  ;;  %v257_v7 = vld [vmem:[%s1946_s10 + $0x70] sm:$0xff] }
  0x19   : > { %250 = vst [vmem:[%s179_s11 + $0x18] sm:$0xff] %v249_v3  ;;  %v259_v8 = vld [vmem:[%s1946_s10 + $0x80] sm:$0xff]  ;;  %v261_v9 = vld [vmem:[%s1946_s10 + $0x90] sm:$0xff] }
  0x1a   : > { %252 = vst [vmem:[%s179_s11 + $0x20] sm:$0xff] %v251_v4  ;;  %v263_v10 = vld [vmem:[%s1946_s10 + $0xa0] sm:$0xff]  ;;  %v265_v11 = vld [vmem:[%s1946_s10 + $0xb0] sm:$0xff] }
  0x1b   : > { %254 = vst [vmem:[%s179_s11 + $0x28] sm:$0xff] %v253_v5  ;;  %v267_v12 = vld [vmem:[%s1946_s10 + $0xc0] sm:$0xff]  ;;  %v269_v13 = vld [vmem:[%s1946_s10 + $0xd0] sm:$0xff] }
  0x1c   : > { %256 = vst [vmem:[%s179_s11 + $0x30] sm:$0xff] %v255_v6  ;;  %v271_v14 = vld [vmem:[%s1946_s10 + $0xe0] sm:$0xff]  ;;  %v273_v15 = vld [vmem:[%s1946_s10 + $0xf0] sm:$0xff] }
  0x1d   : > { %258 = vst [vmem:[%s179_s11 + $0x38] sm:$0xff] %v257_v7 }
  0x1e   : > { %260 = vst [vmem:[%s179_s11 + $0x40] sm:$0xff] %v259_v8 }
  0x1f   : > { %262 = vst [vmem:[%s179_s11 + $0x48] sm:$0xff] %v261_v9 }
  0x20   : > { %264 = vst [vmem:[%s179_s11 + $0x50] sm:$0xff] %v263_v10 }
  0x21   : > { %266 = vst [vmem:[%s179_s11 + $0x58] sm:$0xff] %v265_v11 }
  0x22   : > { %268 = vst [vmem:[%s179_s11 + $0x60] sm:$0xff] %v267_v12 }
  0x23   : > { %270 = vst [vmem:[%s179_s11 + $0x68] sm:$0xff] %v269_v13 }
  0x24   : > { %272 = vst [vmem:[%s179_s11 + $0x70] sm:$0xff] %v271_v14 }
  0x25   : > { %274 = vst [vmem:[%s179_s11 + $0x78] sm:$0xff] %v273_v15 }
  0x26 PF: > { %p1526_p7 = scmp.ge.s32.totalorder %s1855_s21, 1  ;;  %p304_p8 = scmp.lt.s32.totalorder %s1855_s21, 5 }
  0x28   : > { %p305_p9 = pnand %p1526_p7, %p304_p8 }
  0x2a   : > { %308 = sbr.rel (%p305_p9) target bundleno = 540 (0x21c), region = 70 }
  0x2f   : > { %s311_s12 = sand.u32 1, %s1831_s15   ;;  %s1528_s13 = sshll.u32 %s1843_s18, 4 }
  0x30   : > { %s1527_s14 = sshll.u32 %s311_s12, 7  ;;  %p352_p10 = scmp.lt.s32.totalorder %s1528_s13, 31 }
  0x31   : > { %p357_p11 = scmp.lt.s32.totalorder %s1839_s17, 1  ;;  %s313_s24 = scalar_lea.vmem [#allocation2], %s1527_s14 }
  0x32   : > { %s2799_s13 = smov (!%p352_p10, %s1528_s13), 31  ;;  %v1969_v16 = vld [vmem:[%s313_s24] sm:$0xff]  ;;  %v1971_v17 = vld [vmem:[%s313_s24 + $0x8] sm:$0xff]  ;;  %v1973_v18 = vld [vmem:[%s313_s24 + $0x10] sm:$0xff]  ;;  %s1531_s18 = sshll.u32 %s1839_s17, 4 }
  0x33   : > { %s358_s25 = scalar_select %p357_p11, %s1839_s17, 1  ;;  %v1976_v19 = vld [vmem:[%s313_s24 + $0x18] sm:$0xff]  ;;  %v1978_v20 = vld [vmem:[%s313_s24 + $0x20] sm:$0xff]  ;;  %v1980_v21 = vld [vmem:[%s313_s24 + $0x28] sm:$0xff] }
  0x34   : > { %2723 = vst [vmem:[#allocation3_spill] sm:$0xff] %v1976_v19  ;;  %s1529_s15 = sshll.u32 %s2799_s13, 3  ;;  %v1983_v22 = vld [vmem:[%s313_s24 + $0x30] sm:$0xff]  ;;  %v1985_v23 = vld [vmem:[%s313_s24 + $0x38] sm:$0xff]  ;;  %v1987_v24 = vld [vmem:[%s313_s24 + $0x40] sm:$0xff]  ;;  %p362_p12 = scmp.lt.s32.totalorder %s1531_s18, 31 }
  0x35   : > { %2724 = vst [vmem:[#allocation4_spill] sm:$0xff] %v1978_v20  ;;  %s355_s29 = scalar_lea.vmem %s2683_s1, %s1529_s15  ;;  %v1992_v25 = vld [vmem:[%s313_s24 + $0x48] sm:$0xff]  ;;  %v1994_v26 = vld [vmem:[%s313_s24 + $0x50] sm:$0xff]  ;;  %v1996_v27 = vld [vmem:[%s313_s24 + $0x58] sm:$0xff]  ;;  %s1530_s30 = sshll.u32 %s358_s25, 2 }
  0x36   : > { %2725 = vst [vmem:[#allocation5_spill] sm:$0xff] %v1980_v21  ;;  %v1998_v28 = vld [vmem:[%s313_s24 + $0x60] sm:$0xff]  ;;  %v2000_v29 = vld [vmem:[%s313_s24 + $0x68] sm:$0xff]  ;;  %v2002_v30 = vld [vmem:[%s313_s24 + $0x70] sm:$0xff]  ;;  %s2007_s7 = scalar_lea.vmem %s2686_s4, %s1529_s15  ;;  %s2801_s18 = smov (!%p362_p12, %s1531_s18), 31 }
  0x37   : > { %2726 = vst [vmem:[#allocation6_spill] sm:$0xff] %v1983_v22  ;;  %v2009_v31 = vld [vmem:[%s313_s24 + $0x78] sm:$0xff]  ;;  %v2011_v32 = vld [vmem:[%s355_s29] sm:$0xff]  ;;  %v2013_v33 = vld [vmem:[%s355_s29 + $0x8] sm:$0xff]  ;;  %s360_s10 = scalar_lea.vmem %s2684_s2, %s1530_s30  ;;  %s1532_s11 = sshll.u32 %s2801_s18, 3 }
  0x38   : > { %2727 = vst [vmem:[#allocation7_spill] sm:$0xff] %v1985_v23  ;;  %v2015_v34 = vld [vmem:[%s355_s29 + $0x10] sm:$0xff]  ;;  %v2017_v35 = vld [vmem:[%s355_s29 + $0x18] sm:$0xff]  ;;  %v2019_v36 = vld [vmem:[%s355_s29 + $0x20] sm:$0xff]  ;;  %s365_s14 = scalar_lea.vmem %s2685_s3, %s1532_s11  ;;  %p1535_p13 = scmp.ne.s32.totalorder %s1839_s17, 0 }
  0x39   : > { %2728 = vst [vmem:[#allocation8_spill] sm:$0xff] %v1987_v24  ;;  %v2024_v37 = vld [vmem:[%s355_s29 + $0x28] sm:$0xff]  ;;  %v2026_v38 = vld [vmem:[%s355_s29 + $0x30] sm:$0xff]  ;;  %v2028_v39 = vld [vmem:[%s355_s29 + $0x38] sm:$0xff] }
  0x3a   : > { %2729 = vst [vmem:[#allocation9_spill] sm:$0xff] %v1992_v25  ;;  %v2030_v40 = vld [vmem:[%s355_s29 + $0x40] sm:$0xff]  ;;  %v2032_v41 = vld [vmem:[%s355_s29 + $0x48] sm:$0xff]  ;;  %v2034_v42 = vld [vmem:[%s355_s29 + $0x50] sm:$0xff] }
  0x3b   : > { %2730 = vst [vmem:[#allocation10_spill] sm:$0xff] %v1994_v26  ;;  %v2039_v43 = vld [vmem:[%s355_s29 + $0x58] sm:$0xff]  ;;  %v2041_v44 = vld [vmem:[%s355_s29 + $0x60] sm:$0xff]  ;;  %v2043_v45 = vld [vmem:[%s355_s29 + $0x68] sm:$0xff] }
  0x3c   : > { %2731 = vst [vmem:[#allocation11_spill] sm:$0xff] %v1996_v27  ;;  %v2045_v46 = vld [vmem:[%s355_s29 + $0x70] sm:$0xff]  ;;  %v2047_v47 = vld [vmem:[%s355_s29 + $0x78] sm:$0xff]  ;;  %v2049_v48 = vld [vmem:[%s360_s10] sm:$0x7] }
  0x3d   : > { %2732 = vst [vmem:[#allocation12_spill] sm:$0xff] %v2002_v30  ;;  %v2051_v49 = vld [vmem:[%s365_s14] sm:$0xff]  ;;  %v2053_v50 = vld [vmem:[%s365_s14 + $0x8] sm:$0xff]  ;;  %v2055_v51 = vld [vmem:[%s365_s14 + $0x10] sm:$0xff] }
  0x3e   : > { %2733 = vst [vmem:[#allocation13_spill] sm:$0xff] %v2009_v31  ;;  %v2057_v52 = vld [vmem:[%s365_s14 + $0x18] sm:$0xff]  ;;  %v2059_v53 = vld [vmem:[%s365_s14 + $0x20] sm:$0xff]  ;;  %v2061_v54 = vld [vmem:[%s365_s14 + $0x28] sm:$0xff] }
  0x3f   : > { %2734 = vst [vmem:[#allocation14_spill] sm:$0xff] %v2011_v32  ;;  %v2063_v55 = vld [vmem:[%s365_s14 + $0x30] sm:$0xff]  ;;  %v2065_v56 = vld [vmem:[%s365_s14 + $0x38] sm:$0xff]  ;;  %v2067_v57 = vld [vmem:[%s365_s14 + $0x40] sm:$0xff] }
  0x40   : > { %2735 = vst [vmem:[#allocation15_spill] sm:$0xff] %v2013_v33  ;;  %v2069_v58 = vld [vmem:[%s365_s14 + $0x48] sm:$0xff]  ;;  %v2071_v59 = vld [vmem:[%s365_s14 + $0x50] sm:$0xff]  ;;  %v2073_v60 = vld [vmem:[%s365_s14 + $0x58] sm:$0xff] }
  0x41   : > { %2736 = vst [vmem:[#allocation16_spill] sm:$0xff] %v2015_v34  ;;  %v2075_v61 = vld [vmem:[%s365_s14 + $0x60] sm:$0xff]  ;;  %v2077_v62 = vld [vmem:[%s365_s14 + $0x68] sm:$0xff]  ;;  %v2079_v63 = vld [vmem:[%s365_s14 + $0x70] sm:$0xff] }
  0x42   : > { %2737 = vst [vmem:[#allocation17_spill] sm:$0xff] %v2017_v35  ;;  %v2081_v0 = vld [vmem:[%s365_s14 + $0x78] sm:$0xff] }
  0x43   : > { %2738 = vst [vmem:[#allocation18_spill] sm:$0xff] %v2019_v36 }
  0x44   : > { %2739 = vst [vmem:[#allocation19_spill] sm:$0xff] %v2024_v37 }
  0x45   : > { %2740 = vst [vmem:[#allocation20_spill] sm:$0xff] %v2026_v38 }
  0x46   : > { %2741 = vst [vmem:[#allocation21_spill] sm:$0xff] %v2028_v39 }
  0x47   : > { %2742 = vst [vmem:[#allocation22_spill] sm:$0xff] %v2030_v40 }
  0x48   : > { %2743 = vst [vmem:[#allocation23_spill] sm:$0xff] %v2032_v41 }
  0x49   : > { %2744 = vst [vmem:[#allocation24_spill] sm:$0xff] %v2034_v42  ;;  %425 = sbr.rel (%p1535_p13) target bundleno = 110 (0x6e), region = 78 }
  0x4a   : > { %2745 = vst [vmem:[#allocation25_spill] sm:$0xff] %v2041_v44 }
  0x4b   : > { %2746 = vst [vmem:[#allocation26_spill] sm:$0xff] %v2043_v45 }
  0x4c   : > { %2747 = vst [vmem:[#allocation27_spill] sm:$0xff] %v2045_v46 }
  0x4d   : > { %2748 = vst [vmem:[#allocation28_spill] sm:$0xff] %v2047_v47 }
  0x4e   : > { %v426_v1 = vmul.f32 0.2, %v2011_v32  ;;  %v1536_v2 = vadd.f32 -1.0, %v2011_v32  ;;  %vm522_vm0 = vcmask 23552   ;;  %v427_v3 = vmul.f32 0.2, %v2013_v33 }
  0x4f   : > { %v1537_v4 = vadd.f32 -1.0, %v2013_v33  ;;  %v428_v5 = vmul.f32 0.2, %v2015_v34  ;;  %v1538_v6 = vadd.f32 -1.0, %v2015_v34  ;;  %v429_v7 = vmul.f32 0.2, %v2017_v35 }
  0x50   : > { %v442_v8 = vsub.f32 1.0, %v426_v1  ;;  %v443_v9 = vsub.f32 1.0, %v427_v3  ;;  %v1539_v10 = vadd.f32 -1.0, %v2017_v35  ;;  %v430_v11 = vmul.f32 0.2, %v2019_v36 }
  0x51   : > { %v444_v12 = vsub.f32 1.0, %v428_v5  ;;  %v445_v13 = vsub.f32 1.0, %v429_v7  ;;  %v1540_v14 = vadd.f32 -1.0, %v2019_v36  ;;  %v431_v15 = vmul.f32 0.2, %v2024_v37 }
  0x52   : > { %v458_v27 = vmul.f32 %v442_v8, %v2011_v32  ;;  %v459_v26 = vmul.f32 %v443_v9, %v2013_v33  ;;  %v446_v25 = vsub.f32 1.0, %v430_v11  ;;  %v1541_v24 = vadd.f32 -1.0, %v2024_v37 }
  0x53   : > { %v460_v1 = vmul.f32 %v444_v12, %v2015_v34  ;;  %v461_v3 = vmul.f32 %v445_v13, %v2017_v35  ;;  %v447_v23 = vsub.f32 1.0, %v431_v15  ;;  %v432_v22 = vmul.f32 0.2, %v2026_v38 }
  0x54   : > { %v490_v5 = vmul.f32 %v1536_v2, %v458_v27  ;;  %v491_v7 = vmul.f32 %v1537_v4, %v459_v26  ;;  %v462_v21 = vmul.f32 %v446_v25, %v2019_v36  ;;  %v1542_v20 = vadd.f32 -1.0, %v2026_v38 }
  0x55   : > { %v492_v8 = vmul.f32 %v1538_v6, %v460_v1  ;;  %v493_v31 = vmul.f32 %v1539_v10, %v461_v3  ;;  %v463_v9 = vmul.f32 %v447_v23, %v2024_v37  ;;  %v448_v11 = vsub.f32 1.0, %v432_v22 }
  0x56   : > { %v506_v19 = vadd.f32 0.1, %v490_v5  ;;  %v507_v12 = vadd.f32 0.1, %v491_v7  ;;  %v494_v30 = vmul.f32 %v1540_v14, %v462_v21  ;;  %v433_v13 = vmul.f32 0.2, %v2028_v39 }
  0x57   : > { %v508_v15 = vadd.f32 0.1, %v492_v8  ;;  %v509_v27 = vadd.f32 0.1, %v493_v31  ;;  %v495_v2 = vmul.f32 %v1541_v24, %v463_v9  ;;  %v464_v26 = vmul.f32 %v448_v11, %v2026_v38 }
  0x58   : > { %523 = vst.msk [vmem:[%s2007_s7] sm:$0xff] %vm522_vm0, %v506_v19  ;;  %v510_v25 = vadd.f32 0.1, %v494_v30  ;;  %v449_v4 = vsub.f32 1.0, %v433_v13  ;;  %v1543_v6 = vadd.f32 -1.0, %v2028_v39  ;;  %v1544_v22 = vadd.f32 -1.0, %v2030_v40 }
  0x59   : > { %524 = vst.msk [vmem:[%s2007_s7 + $0x8] sm:$0xff] %vm522_vm0, %v507_v12  ;;  %v511_v21 = vadd.f32 0.1, %v495_v2  ;;  %v496_v23 = vmul.f32 %v1542_v20, %v464_v26  ;;  %v434_v10 = vmul.f32 0.2, %v2030_v40  ;;  %v1545_v24 = vadd.f32 -1.0, %v2032_v41 }
  0x5a   : > { %525 = vst.msk [vmem:[%s2007_s7 + $0x10] sm:$0xff] %vm522_vm0, %v508_v15  ;;  %v465_v19 = vmul.f32 %v449_v4, %v2028_v39  ;;  %v435_v30 = vmul.f32 0.2, %v2032_v41  ;;  %v436_v31 = vmul.f32 0.2, %v2034_v42  ;;  %v1546_v14 = vadd.f32 -1.0, %v2034_v42 }
  0x5b   : > { %526 = vst.msk [vmem:[%s2007_s7 + $0x18] sm:$0xff] %vm522_vm0, %v509_v27  ;;  %v512_v1 = vadd.f32 0.1, %v496_v23  ;;  %v450_v20 = vsub.f32 1.0, %v434_v10  ;;  %v437_v3 = vmul.f32 0.2, %v2039_v43 }
  0x5c   : > { %527 = vst.msk [vmem:[%s2007_s7 + $0x20] sm:$0xff] %vm522_vm0, %v510_v25  ;;  %v497_v5 = vmul.f32 %v1543_v6, %v465_v19  ;;  %v451_v7 = vsub.f32 1.0, %v435_v30  ;;  %v452_v8 = vsub.f32 1.0, %v436_v31  ;;  %v1547_v9 = vadd.f32 -1.0, %v2039_v43 }
  0x5d   : > { %528 = vst.msk [vmem:[%s2007_s7 + $0x28] sm:$0xff] %vm522_vm0, %v511_v21  ;;  %v466_v11 = vmul.f32 %v450_v20, %v2030_v40  ;;  %v453_v12 = vsub.f32 1.0, %v437_v3  ;;  %v438_v13 = vmul.f32 0.2, %v2041_v44  ;;  %v1548_v15 = vadd.f32 -1.0, %v2041_v44 }
  0x5e   : > { %529 = vst.msk [vmem:[%s2007_s7 + $0x30] sm:$0xff] %vm522_vm0, %v512_v1  ;;  %v513_v27 = vadd.f32 0.1, %v497_v5  ;;  %v467_v2 = vmul.f32 %v451_v7, %v2032_v41  ;;  %v468_v26 = vmul.f32 %v452_v8, %v2034_v42  ;;  %v439_v25 = vmul.f32 0.2, %v2043_v45 }
  0x5f   : > { %v498_v4 = vmul.f32 %v1544_v22, %v466_v11  ;;  %v469_v6 = vmul.f32 %v453_v12, %v2039_v43  ;;  %v454_v21 = vsub.f32 1.0, %v438_v13  ;;  %v1549_v23 = vadd.f32 -1.0, %v2043_v45 }
  0x60   : > { %530 = vst.msk [vmem:[%s2007_s7 + $0x38] sm:$0xff] %vm522_vm0, %v513_v27  ;;  %v499_v10 = vmul.f32 %v1545_v24, %v467_v2  ;;  %v500_v19 = vmul.f32 %v1546_v14, %v468_v26  ;;  %v455_v30 = vsub.f32 1.0, %v439_v25  ;;  %v440_v31 = vmul.f32 0.2, %v2045_v46 }
  0x61   : > { %v514_v1 = vadd.f32 0.1, %v498_v4  ;;  %v501_v20 = vmul.f32 %v1547_v9, %v469_v6  ;;  %v470_v3 = vmul.f32 %v454_v21, %v2041_v44  ;;  %v1550_v22 = vadd.f32 -1.0, %v2045_v46 }
  0x62   : > { %v515_v5 = vadd.f32 0.1, %v499_v10  ;;  %v516_v7 = vadd.f32 0.1, %v500_v19  ;;  %v471_v8 = vmul.f32 %v455_v30, %v2043_v45  ;;  %v456_v11 = vsub.f32 1.0, %v440_v31 }
  0x63   : > { %531 = vst.msk [vmem:[%s2007_s7 + $0x40] sm:$0xff] %vm522_vm0, %v514_v1  ;;  %v517_v24 = vadd.f32 0.1, %v501_v20  ;;  %v502_v14 = vmul.f32 %v1548_v15, %v470_v3  ;;  %v441_v12 = vmul.f32 0.2, %v2047_v47  ;;  %v1551_v26 = vadd.f32 -1.0, %v2047_v47 }
  0x64   : > { %532 = vst.msk [vmem:[%s2007_s7 + $0x48] sm:$0xff] %vm522_vm0, %v515_v5  ;;  %v503_v9 = vmul.f32 %v1549_v23, %v471_v8  ;;  %v472_v13 = vmul.f32 %v456_v11, %v2045_v46 }
  0x65   : > { %533 = vst.msk [vmem:[%s2007_s7 + $0x50] sm:$0xff] %vm522_vm0, %v516_v7  ;;  %v518_v27 = vadd.f32 0.1, %v502_v14  ;;  %v457_v2 = vsub.f32 1.0, %v441_v12 }
  0x66   : > { %534 = vst.msk [vmem:[%s2007_s7 + $0x58] sm:$0xff] %vm522_vm0, %v517_v24  ;;  %v519_v25 = vadd.f32 0.1, %v503_v9  ;;  %v504_v4 = vmul.f32 %v1550_v22, %v472_v13 }
  0x67   : > { %535 = vst.msk [vmem:[%s2007_s7 + $0x60] sm:$0xff] %vm522_vm0, %v518_v27  ;;  %v473_v15 = vmul.f32 %v457_v2, %v2047_v47 }
  0x68   : > { %536 = vst.msk [vmem:[%s2007_s7 + $0x68] sm:$0xff] %vm522_vm0, %v519_v25  ;;  %v520_v6 = vadd.f32 0.1, %v504_v4 }
  0x69   : > { %v505_v21 = vmul.f32 %v1551_v26, %v473_v15 }
  0x6a   : > { %537 = vst.msk [vmem:[%s2007_s7 + $0x70] sm:$0xff] %vm522_vm0, %v520_v6 }
  0x6b   : > { %v521_v23 = vadd.f32 0.1, %v505_v21 }
  0x6d   : > { %538 = vst.msk [vmem:[%s2007_s7 + $0x78] sm:$0xff] %vm522_vm0, %v521_v23 }
  0x6e PF: > { %v539_v10 = vmul.f32 0.9, %v2011_v32  ;;  %v2700_v19 = vmov 2   ;;  %v2698_v30 = vmov 0   ;;  %v552_v31 = vmul.f32 0.9, %v2043_v45 }
  0x6f   : > { %1666 = vset.pattern.permute.xlu0 %v2700_v19  ;;  %1667 = vset.pattern.permute.xlu1 %v2698_v30  ;;  %v2702_v20 = vmov 1   ;;  %v542_v22 = vmul.f32 0.9, %v2017_v35  ;;  %v540_v5 = vmul.f32 0.9, %v2013_v33  ;;  %v749_v6 = vlaneseq }
  0x70   : > { %v555_v1 = vadd.f32 5.0, %v539_v10  ;;  %1669 = vset.pattern.permute.xlu2 %v2702_v20  ;;  %v2169_v3 = vadd.f32 5.0, %v552_v31  ;;  %v551_v11 = vmul.f32 0.9, %v2041_v44  ;;  %v553_v14 = vmul.f32 0.9, %v2045_v46 }
  0x71   : > { %v558_v7 = vadd.f32 5.0, %v542_v22  ;;  %v556_v8 = vadd.f32 5.0, %v540_v5  ;;  %v541_v12 = vmul.f32 0.9, %v2015_v34  ;;  %v544_v27 = vmul.f32 0.9, %v2024_v37 }
  0x72   : > { %574 = vperm.xlu1 %1667, %v555_v1   ;;  %1081 = vperm.xlu0 %1666, %v555_v1   ;;  %v567_v24 = vadd.f32 5.0, %v551_v11  ;;  %v2182_v9 = vadd.f32 5.0, %v553_v14  ;;  %v554_v2 = vmul.f32 0.9, %v2047_v47  ;;  %v543_v4 = vmul.f32 0.9, %v2019_v36 }
  0x73   : > { %823 = vperm.xlu2 %1669, %v2169_v3   ;;  %v557_v13 = vadd.f32 5.0, %v541_v12  ;;  %v560_v26 = vadd.f32 5.0, %v544_v27  ;;  %v750_v21 = vand.u32 127, %v749_v6  ;;  %v1860_v23 = vmov 0.0  }
  0x74   : > { %v2189_v25 = vadd.f32 5.0, %v554_v2  ;;  %v559_v15 = vadd.f32 5.0, %v543_v4  ;;  %v2749_v47 = vmov 1   ;;  %v548_v44 = vmul.f32 0.9, %v2032_v41 }
  0x75   : > { %vm751_vm1 = vcmp.eq.s32.totalorder %v750_v21, 0  ;;  %vm1241_vm2 = vcmp.eq.s32.totalorder %v750_v21, 2  ;;  %vm931_vm3 = vcmp.eq.s32.totalorder %v750_v21, 1  ;;  %v547_v33 = vmul.f32 0.9, %v2030_v40 }
  0x76   : > { %v2203_v10 = vsel %vm751_vm1, 1.0, %v1860_v23  ;;  %v2205_v31 = vsel %vm1241_vm2, 1.0, %v1860_v23  ;;  %v2256_v2 = vsel %vm931_vm3, 1.0, %v1860_v23  ;;  %v2354_v37 = vadd.f32 5.0, %v548_v44 }
  0x77   : > { %v2213_v22 = vmul.f32 %v2205_v31, %v2081_v0  ;;  %v2218_v5 = vmul.f32 %v2203_v10, %v2079_v63  ;;  %v2233_v11 = vmul.f32 %v2205_v31, %v2077_v62  ;;  %v2240_v14 = vmul.f32 %v2203_v10, %v2075_v61 }
  0x78   : > { %v2244_v12 = vmul.f32 %v2205_v31, %v2075_v61  ;;  %v2254_v27 = vmul.f32 %v2205_v31, %v2073_v60  ;;  %v949_v4 = vmul.f32 %v2256_v2, %v2081_v0  ;;  %v2270_v6 = vmul.f32 %v2205_v31, %v2071_v59 }
  0x79   : > { %1260 = vmatpush.msra.mxu2 %v2213_v22  ;;  %v948_v21 = vmul.f32 %v2256_v2, %v2079_v63  ;;  %v2283_v23 = vmul.f32 %v2205_v31, %v2069_v58  ;;  %v944_v46 = vmul.f32 %v2256_v2, %v2071_v59  ;;  %v2333_v45 = vmul.f32 %v2205_v31, %v2061_v54 }
  0x7a   : > { %1668 = vset.pattern.permute.xlu1 %v2702_v20  ;;  %1093 = vperm.xlu0 %1666, %v558_v7   ;;  %v942_v41 = vmul.f32 %v2256_v2, %v2067_v57  ;;  %v2359_v36 = vmul.f32 %v2203_v10, %v2057_v52  ;;  %v2753_v44 = vmov 2   ;;  %v2377_v35 = vmul.f32 %v2205_v31, %v2055_v51 }
  0x7b   : > { %771 = vperm.xlu1 %1668, %v555_v1   ;;  %1670 = vset.pattern.permute.xlu2 %v2700_v19  ;;  %v2209_v1 = vmul.f32 %v2203_v10, %v2081_v0  ;;  %v2278_v0 = vmul.f32 %v2203_v10, %v2069_v58  ;;  %2750 = vst [vmem:[#allocation29_spill] sm:$0xff] %v2333_v45  ;;  %vm1389_vm4 = vcmask 23552  }
  0x7c   : > { %1085 = vperm.xlu2 %1670, %v556_v8   ;;  %950 = vmatpush.msra.mxu0 %v949_v4  ;;  %v940_v34 = vmul.f32 %v2256_v2, %v2063_v55  ;;  %v2390_v32 = vmul.f32 %v2205_v31, %v2053_v50  ;;  %v2402_v40 = vmul.f32 %v2205_v31, %v2051_v49 }
  0x7d   : > { %1015 = vmatpush.msra.mxu1 %v2209_v1  ;;  %1558 = vmatpush.msra.mxu3 %v949_v4  ;;  %v945_v4 = vmul.f32 %v2256_v2, %v2073_v60 }
  0x7e   : > { %951 = vmatpush.msra.mxu0 %v948_v21  ;;  %2755 = vst [vmem:[#allocation32_spill] sm:$0xff] %v2402_v40 }
  0x7f   : > { %1016 = vmatpush.msra.mxu1 %v2218_v5  ;;  %1559 = vmatpush.msra.mxu3 %v948_v21  ;;  %v2320_v21 = vmul.f32 %v2205_v31, %v2063_v55 }
  0x82   : > { %1677 = vset.pattern.permute.xlu0 %v2702_v20 }
  0x83   : > { %1671 = vset.pattern.permute.xlu1 %v2698_v30  ;;  %819 = vperm.xlu0 %1677, %v567_v24  }
  0x84   : > { %579 = vperm.xlu1 %1671, %v556_v8   ;;  %1672 = vset.pattern.permute.xlu2 %v2702_v20 }
  0x85   : > { %775 = vperm.xlu2 %1672, %v556_v8   ;;  %v2229_v8 = vmul.f32 %v2203_v10, %v2077_v62 }
  0x87   : > { %1017 = vmatpush.msra.mxu1 %v2229_v8 }
  0x89   : > { %1018 = vmatpush.msra.mxu1 %v2240_v14 }
  0x8b   : > { %827 = vperm.xlu0 %1677, %v2182_v9  }
  0x8c   : > { %1673 = vset.pattern.permute.xlu1 %v2700_v19 }
  0x8d   : > { %1089 = vperm.xlu1 %1673, %v557_v13   ;;  %1674 = vset.pattern.permute.xlu2 %v2698_v30 }
  0x8e   : > { %584 = vperm.xlu2 %1674, %v557_v13  }
  0x93   : > { %791 = vperm.xlu0 %1677, %v560_v26  }
  0x95   : > { %1675 = vset.pattern.permute.xlu1 %v2702_v20 }
  0x96   : > { %779 = vperm.xlu1 %1675, %v557_v13   ;;  %1676 = vset.pattern.permute.xlu2 %v2702_v20  ;;  %v2250_v13 = vmul.f32 %v2203_v10, %v2073_v60  ;;  %v2327_v60 = vmul.f32 %v2203_v10, %v2061_v54 }
  0x97   : > { %831 = vperm.xlu2 %1676, %v2189_v25  }
  0x98   : > { %1019 = vmatpush.msra.mxu1 %v2250_v13 }
  0x9b   : > { %1683 = vset.pattern.permute.xlu0 %v2698_v30 }
  0x9c   : > { %594 = vperm.xlu0 %1683, %v559_v15  }
  0x9e   : > { %1678 = vset.pattern.permute.xlu1 %v2698_v30 }
  0x9f   : > { %589 = vperm.xlu1 %1678, %v558_v7   ;;  %783 = vperm.xlu2 %1676, %v558_v7   ;;  %v2222_v7 = vmul.f32 %v2205_v31, %v2079_v63  ;;  %v2291_v63 = vmul.f32 %v2203_v10, %v2067_v57 }
  0xa1   : > { %1261 = vmatpush.msra.mxu2 %v2222_v7 }
  0xa3   : > { %1262 = vmatpush.msra.mxu2 %v2233_v11 }
  0xa4   : > { %649 = vperm.xlu0 %1683, %v2189_v25  }
  0xa5   : > { %1263 = vmatpush.msra.mxu2 %v2244_v12 }
  0xa7   : > { %634 = vperm.xlu1 %1678, %v567_v24   ;;  %1679 = vset.pattern.permute.xlu2 %v2700_v19 }
  0xa8   : > { %1097 = vperm.xlu2 %1679, %v559_v15   ;;  %1264 = vmatpush.msra.mxu2 %v2254_v27 }
  0xaa   : > { %1265 = vmatpush.msra.mxu2 %v2270_v6 }
  0xac   : > { %1691 = vset.pattern.permute.xlu0 %v2700_v19  ;;  %1266 = vmatpush.msra.mxu2 %v2283_v23 }
  0xad   : > { %1129 = vperm.xlu0 %1691, %v567_v24   ;;  %v545_v24 = vmul.f32 0.9, %v2026_v38  ;;  %v2341_v38 = vmul.f32 %v2203_v10, %v2059_v53 }
  0xaf   : > { %1680 = vset.pattern.permute.xlu1 %v2702_v20  ;;  %v2308_v20 = vmul.f32 %v2205_v31, %v2065_v56 }
  0xb0   : > { %787 = vperm.xlu1 %1680, %v559_v15   ;;  %1681 = vset.pattern.permute.xlu2 %v2698_v30  ;;  %v2264_v15 = vmul.f32 %v2203_v10, %v2071_v59  ;;  %v943_v59 = vmul.f32 %v2256_v2, %v2069_v58 }
  0xb1   : > { %639 = vperm.xlu2 %1681, %v2169_v3  }
  0xb2   : > { %1020 = vmatpush.msra.mxu1 %v2264_v15 }
  0xb4   : > { %1021 = vmatpush.msra.mxu1 %v2278_v0 }
  0xb5   : > { %1696 = vset.pattern.permute.xlu0 %v2698_v30 }
  0xb6   : > { %1022 = vmatpush.msra.mxu1 %v2291_v63  ;;  %619 = vperm.xlu0 %1696, %v2354_v37  }
  0xb8   : > { %1682 = vset.pattern.permute.xlu1 %v2700_v19 }
  0xb9   : > { %1101 = vperm.xlu1 %1682, %v560_v26   ;;  %599 = vperm.xlu2 %1681, %v560_v26   ;;  %v561_v26 = vadd.f32 5.0, %v545_v24  ;;  %v947_v24 = vmul.f32 %v2256_v2, %v2077_v62  ;;  %v2303_v62 = vmul.f32 %v2203_v10, %v2065_v56 }
  0xbb   : > { %952 = vmatpush.msra.mxu0 %v947_v24  ;;  %1560 = vmatpush.msra.mxu3 %v947_v24  ;;  %v546_v24 = vmul.f32 0.9, %v2028_v39  ;;  %v2348_v39 = vmul.f32 %v2205_v31, %v2059_v53 }
  0xbc   : > { %1023 = vmatpush.msra.mxu1 %v2303_v62 }
  0xbd   : > { %2751 = vst [vmem:[#allocation30_spill] sm:$0xff] %v2348_v39  ;;  %v562_v58 = vadd.f32 5.0, %v546_v24  ;;  %v2754_v24 = vmov 0  }
  0xbe   : > { %1700 = vset.pattern.permute.xlu0 %v2749_v47 }
  0xc1   : > { %1684 = vset.pattern.permute.xlu1 %v2698_v30  ;;  %1685 = vset.pattern.permute.xlu2 %v2700_v19  ;;  %v2295_v30 = vmul.f32 %v2205_v31, %v2067_v57  ;;  %v946_v19 = vmul.f32 %v2256_v2, %v2075_v61  ;;  %v2315_v61 = vmul.f32 %v2203_v10, %v2063_v55 }
  0xc2   : > { %644 = vperm.xlu1 %1684, %v2182_v9   ;;  %1105 = vperm.xlu2 %1685, %v561_v26   ;;  %v941_v57 = vmul.f32 %v2256_v2, %v2065_v56  ;;  %v2384_v56 = vmul.f32 %v2203_v10, %v2053_v50 }
  0xc3   : > { %1267 = vmatpush.msra.mxu2 %v2295_v30  ;;  %953 = vmatpush.msra.mxu0 %v946_v19 }
  0xc4   : > { %1024 = vmatpush.msra.mxu1 %v2315_v61  ;;  %1561 = vmatpush.msra.mxu3 %v946_v19  ;;  %v2364_v19 = vmul.f32 %v2205_v31, %v2057_v52 }
  0xc5   : > { %1268 = vmatpush.msra.mxu2 %v2308_v20  ;;  %954 = vmatpush.msra.mxu0 %v945_v4 }
  0xc6   : > { %1025 = vmatpush.msra.mxu1 %v2327_v60  ;;  %1562 = vmatpush.msra.mxu3 %v945_v4  ;;  %2752 = vst [vmem:[#allocation31_spill] sm:$0xff] %v2364_v19  ;;  %v2372_v4 = vmul.f32 %v2203_v10, %v2055_v51 }
  0xc7   : > { %1269 = vmatpush.msra.mxu2 %v2320_v21  ;;  %955 = vmatpush.msra.mxu0 %v944_v46 }
  0xc8   : > { %1026 = vmatpush.msra.mxu1 %v2341_v38  ;;  %1563 = vmatpush.msra.mxu3 %v944_v46  ;;  %v938_v46 = vmul.f32 %v2256_v2, %v2059_v53  ;;  %v936_v53 = vmul.f32 %v2256_v2, %v2055_v51  ;;  %v934_v51 = vmul.f32 %v2256_v2, %v2051_v49 }
  0xc9   : > { %1270 = vmatpush.msra.mxu2 %v2333_v45  ;;  %956 = vmatpush.msra.mxu0 %v943_v59  ;;  %v2397_v45 = vmul.f32 %v2203_v10, %v2051_v49  ;;  %v571_v10 = vmul.f32 0.1, %v2049_v48 }
  0xca   : > { %604 = vperm.xlu1 %1684, %v561_v26   ;;  %1686 = vset.pattern.permute.xlu2 %v2749_v47 }
  0xcb   : > { %795 = vperm.xlu2 %1686, %v561_v26   ;;  %1271 = vmatpush.msra.mxu2 %v2348_v39  ;;  %v939_v39 = vmul.f32 %v2256_v2, %v2061_v54  ;;  %v937_v54 = vmul.f32 %v2256_v2, %v2057_v52  ;;  %v935_v52 = vmul.f32 %v2256_v2, %v2053_v50  ;;  %v2436_v49 = vperm.slane %v571_v10, 1 }
  0xcc   : > { %957 = vmatpush.msra.mxu0 %v942_v41  ;;  %1027 = vmatpush.msra.mxu1 %v2359_v36 }
  0xcd   : > { %v2343_v26 = vpop.permute.xlu2 %823  ;;  %1272 = vmatpush.msra.mxu2 %v2364_v19  ;;  %1564 = vmatpush.msra.mxu3 %v943_v59  ;;  %v563_v19 = vadd.f32 5.0, %v547_v33  ;;  %v549_v33 = vmul.f32 0.9, %v2034_v42  ;;  %v2423_v59 = vperm.slane %v571_v10, 2 }
  0xce   : > { %958 = vmatpush.msra.mxu0 %v941_v57  ;;  %1028 = vmatpush.msra.mxu1 %v2372_v4 }
  0xcf   : > { %1273 = vmatpush.msra.mxu2 %v2377_v35  ;;  %1565 = vmatpush.msra.mxu3 %v942_v41  ;;  %v2419_v41 = vadd.f32 5.0, %v549_v33 }
  0xd0   : > { %959 = vmatpush.msra.mxu0 %v940_v34  ;;  %1029 = vmatpush.msra.mxu1 %v2384_v56 }
  0xd1   : > { %1274 = vmatpush.msra.mxu2 %v2390_v32  ;;  %1566 = vmatpush.msra.mxu3 %v941_v57 }
  0xd2   : > { %1687 = vset.pattern.permute.xlu1 %v2753_v44  ;;  %960 = vmatpush.msra.mxu0 %v939_v39 }
  0xd3   : > { %1109 = vperm.xlu1 %1687, %v562_v58   ;;  %1688 = vset.pattern.permute.xlu2 %v2754_v24 }
  0xd4   : > { %609 = vperm.xlu2 %1688, %v562_v58   ;;  %1030 = vmatpush.msra.mxu1 %v2397_v45 }
  0xd5   : > { %1275 = vmatpush.msra.mxu2 %v2402_v40  ;;  %961 = vmatpush.msra.mxu0 %v938_v46 }
  0xd6   : > { %v1086_v55 = vpop.permute.xlu2 %1085  ;;  %1567 = vmatpush.msra.mxu3 %v940_v34  ;;  %811 = vperm.xlu0 %1700, %v2419_v41  }
  0xd7   : > { %962 = vmatpush.msra.mxu0 %v937_v54  ;;  %v1146_v48 = vadd.f32 %v2423_v59, %v1086_v55 }
  0xd8   : > { %1568 = vmatpush.msra.mxu3 %v939_v39 }
  0xd9   : > { %963 = vmatpush.msra.mxu0 %v936_v53  ;;  %1705 = vrcp.f32 %v1146_v48 }
  0xda   : > { %1569 = vmatpush.msra.mxu3 %v938_v46 }
  0xdb   : > { %1689 = vset.pattern.permute.xlu1 %v2749_v47  ;;  %964 = vmatpush.msra.mxu0 %v935_v52 }
  0xdc   : > { %799 = vperm.xlu1 %1689, %v562_v58   ;;  %1690 = vset.pattern.permute.xlu2 %v2753_v44  ;;  %v2426_v58 = vperm.slane %v571_v10, 0 }
  0xdd   : > { %1113 = vperm.xlu2 %1690, %v563_v19   ;;  %965 = vmatpush.msra.mxu0 %v934_v51 }
  0xde   : > { %1570 = vmatpush.msra.mxu3 %v937_v54  ;;  %1704 = vset.pattern.permute.xlu0 %v2753_v44 }
  0xdf   : > { %v776_v31 = vpop.permute.xlu2 %775  ;;  %v1706_v2 = vpop.eup %1705 }
  0xe0   : > { %1571 = vmatpush.msra.mxu3 %v936_v53 }
  0xe2   : > { %1572 = vmatpush.msra.mxu3 %v935_v52 }
  0xe4   : > { %1692 = vset.pattern.permute.xlu1 %v2754_v24  ;;  %v575_v57 = vpop.permute.xlu1 %574  ;;  %v1082_v33 = vpop.permute.xlu0 %1081  ;;  %1573 = vmatpush.msra.mxu3 %v934_v51  ;;  %v848_v51 = vadd.f32 %v2436_v49, %v2343_v26 }
  0xe5   : > { %v653_v50 = vadd.f32 %v2426_v58, %v575_v57  ;;  %v1145_v34 = vadd.f32 %v2423_v59, %v1082_v33  ;;  %614 = vperm.xlu1 %1692, %v563_v19   ;;  %1693 = vset.pattern.permute.xlu2 %v2749_v47  ;;  %v836_v57 = vadd.f32 %v2436_v49, %v776_v31 }
  0xe6   : > { %803 = vperm.xlu2 %1693, %v563_v19   ;;  %1574 = vmatpush.msrb.mxu3 %v2209_v1  ;;  %v1178_v31 = vmul.f32 %v1706_v2, %v1146_v48 }
  0xe7   : > { %1707 = vrcp.f32 %v653_v50 }
  0xe8   : > { %1709 = vrcp.f32 %v1145_v34  ;;  %v585_v39 = vpop.permute.xlu2 %584  ;;  %1575 = vmatpush.msrb.mxu3 %v2218_v5 }
  0xea   : > { %1576 = vmatpush.msrb.mxu3 %v2229_v8 }
  0xec   : > { %v1094_v55 = vpop.permute.xlu0 %1093  ;;  %1577 = vmatpush.msrb.mxu3 %v2240_v14 }
  0xed   : > { %v1708_v46 = vpop.eup %1707  ;;  %1694 = vset.pattern.permute.xlu1 %v2753_v44  ;;  %v772_v33 = vpop.permute.xlu1 %771 }
  0xee   : > { %v1710_v19 = vpop.eup %1709  ;;  %v685_v42 = vmul.f32 %v1708_v46, %v653_v50  ;;  %v835_v54 = vadd.f32 %v2436_v49, %v772_v33  ;;  %1117 = vperm.xlu1 %1694, %v2354_v37   ;;  %1695 = vset.pattern.permute.xlu2 %v2753_v44 }
  0xef   : > { %v1177_v53 = vmul.f32 %v1710_v19, %v1145_v34  ;;  %1133 = vperm.xlu2 %1695, %v2169_v3   ;;  %v1194_v34 = vsub.f32 2.0, %v1178_v31  ;;  %1578 = vmatpush.msrb.mxu3 %v2250_v13 }
  0xf0   : > { %v701_v10 = vsub.f32 2.0, %v685_v42  ;;  %1711 = vrcp.f32 %v835_v54 }
  0xf1   : > { %v1193_v52 = vsub.f32 2.0, %v1177_v53  ;;  %1713 = vrcp.f32 %v836_v57  ;;  %v2445_v40 = vpop.permute.xlu2 %831  ;;  %v655_v53 = vadd.f32 %v2426_v58, %v585_v39  ;;  %v1210_v39 = vmul.f32 %v1706_v2, %v1194_v34  ;;  %1579 = vmatpush.msrb.mxu3 %v2264_v15 }
  0xf2   : > { %v717_v50 = vmul.f32 %v1708_v46, %v701_v10  ;;  %1715 = vrcp.f32 %v848_v51 }
  0xf3   : > { %v1209_v33 = vmul.f32 %v1710_v19, %v1193_v52  ;;  %1580 = vmatpush.msrb.mxu3 %v2278_v0 }
  0xf4   : > { %v733_v3 = vmul.f32 %v717_v50, %v1969_v16 }
  0xf5   : > { %v820_v1 = vpop.permute.xlu0 %819  ;;  %v1225_v42 = vmul.f32 %v1209_v33, %v1969_v16  ;;  %1581 = vmatpush.msrb.mxu3 %v2291_v63 }
  0xf6   : > { %v1712_v48 = vpop.eup %1711  ;;  %v847_v5 = vadd.f32 %v2436_v49, %v820_v1  ;;  %1697 = vset.pattern.permute.xlu1 %v2749_v47  ;;  %1031 = vmatmul.f32.vlgmr.msra.gmra.mxu1 %v733_v3  ;;  %v580_v26 = vpop.permute.xlu1 %579 }
  0xf7   : > { %v1714_v46 = vpop.eup %1713  ;;  %v867_v8 = vmul.f32 %v1712_v48, %v835_v54  ;;  %v654_v19 = vadd.f32 %v2426_v58, %v580_v26  ;;  %1276 = vmatmul.f32.vlgmr.msra.gmra.mxu2 %v1225_v42  ;;  %807 = vperm.xlu1 %1697, %v2354_v37   ;;  %v1148_v54 = vadd.f32 %v2423_v59, %v1094_v55 }
  0xf8   : > { %1717 = vrcp.f32 %v847_v5  ;;  %1121 = vperm.xlu2 %1695, %v2419_v41   ;;  %v868_v10 = vmul.f32 %v1714_v46, %v836_v57  ;;  %v1716_v50 = vpop.eup %1715  ;;  %v1226_v37 = vmul.f32 %v1210_v39, %v1971_v17  ;;  %1582 = vmatpush.msrb.mxu3 %v2303_v62 }
  0xf9   : > { %v883_v14 = vsub.f32 2.0, %v867_v8  ;;  %1719 = vrcp.f32 %v654_v19  ;;  %v784_v31 = vpop.permute.xlu2 %783  ;;  %v880_v34 = vmul.f32 %v1716_v50, %v848_v51 }
  0xfa   : > { %1721 = vrcp.f32 %v655_v53  ;;  %v884_v1 = vsub.f32 2.0, %v868_v10  ;;  %1583 = vmatpush.msrb.mxu3 %v2315_v61 }
  0xfb   : > { %v899_v52 = vmul.f32 %v1712_v48, %v883_v14  ;;  %1723 = vrcp.f32 %v1148_v54  ;;  %v550_v48 = vmul.f32 0.9, %v2039_v43  ;;  %v896_v14 = vsub.f32 2.0, %v880_v34 }
  0xfc   : > { %v900_v51 = vmul.f32 %v1714_v46, %v884_v1  ;;  %1584 = vmatpush.msrb.mxu3 %v2327_v60 }
  0xfd   : > { %v915_v33 = vmul.f32 %v899_v52, %v1969_v16  ;;  %v828_v3 = vpop.permute.xlu0 %827  ;;  %v2478_v39 = vadd.f32 5.0, %v550_v48 }
  0xfe   : > { %v1718_v13 = vpop.eup %1717  ;;  %v849_v2 = vadd.f32 %v2436_v49, %v828_v3  ;;  %v916_v61 = vmul.f32 %v900_v51, %v1971_v17  ;;  %1585 = vmatpush.msrb.mxu3 %v2341_v38 }
  0xff   : > { %v1720_v57 = vpop.eup %1719  ;;  %v879_v15 = vmul.f32 %v1718_v13, %v847_v5  ;;  %1279 = vmatmul.f32.gmra.mxu2 %v1226_v37  ;;  %1698 = vset.pattern.permute.xlu1 %v2753_v44  ;;  %v1090_v55 = vpop.permute.xlu1 %1089 }
 0x100   : > { %v1722_v0 = vpop.eup %1721  ;;  %v686_v42 = vmul.f32 %v1720_v57, %v654_v19  ;;  %966 = vmatmul.f32.vlgmr.msra.gmra.mxu0 %v915_v33  ;;  %v1147_v16 = vadd.f32 %v2423_v59, %v1090_v55  ;;  %1137 = vperm.xlu1 %1698, %v2182_v9   ;;  %1725 = vrcp.f32 %v849_v2  ;;  %v850_v9 = vadd.f32 %v2436_v49, %v2445_v40 }
 0x101   : > { %v895_v26 = vsub.f32 2.0, %v879_v15  ;;  %1699 = vset.pattern.permute.xlu2 %v2754_v24  ;;  %v687_v8 = vmul.f32 %v1722_v0, %v655_v53  ;;  %v1724_v52 = vpop.eup %1723  ;;  %v838_v53 = vadd.f32 %v2436_v49, %v784_v31  ;;  %1586 = vmatpush.msrb.mxu3 %v2359_v36 }
 0x102   : > { %v702_v63 = vsub.f32 2.0, %v686_v42  ;;  %1727 = vrcp.f32 %v1147_v16  ;;  %v1098_v5 = vpop.permute.xlu2 %1097  ;;  %624 = vperm.xlu2 %1699, %v2419_v41   ;;  %v1180_v34 = vmul.f32 %v1724_v52, %v1148_v54 }
 0x103   : > { %v911_v19 = vmul.f32 %v1718_v13, %v895_v26  ;;  %v1149_v37 = vadd.f32 %v2423_v59, %v1098_v5  ;;  %v703_v40 = vsub.f32 2.0, %v687_v8  ;;  %1729 = vrcp.f32 %v850_v9  ;;  %1587 = vmatpush.msrb.mxu3 %v2372_v4 }
 0x104   : > { %v718_v10 = vmul.f32 %v1720_v57, %v702_v63  ;;  %v912_v57 = vmul.f32 %v1716_v50, %v896_v14  ;;  %v1196_v54 = vsub.f32 2.0, %v1180_v34 }
 0x105   : > { %v927_v62 = vmul.f32 %v911_v19, %v1998_v28  ;;  %v2482_v46 = vpop.permute.xlu0 %791  ;;  %1731 = vrcp.f32 %v1149_v37  ;;  %1588 = vmatpush.msrb.mxu3 %v2384_v56 }
 0x106   : > { %v1726_v41 = vpop.eup %1725  ;;  %v734_v33 = vmul.f32 %v718_v10, %v1971_v17  ;;  %1733 = vrcp.f32 %v838_v53  ;;  %v928_v50 = vmul.f32 %v912_v57, %v2000_v29  ;;  %v1212_v5 = vmul.f32 %v1724_v52, %v1196_v54  ;;  %v2756_v10 = vld [vmem:[#allocation12_spill] sm:$0xff] }
 0x107   : > { %v881_v3 = vmul.f32 %v1726_v41, %v849_v2  ;;  %1002 = vmatmul.f32.vlgmr.msra.gmra.mxu3 %v927_v62  ;;  %v719_v2 = vmul.f32 %v1722_v0, %v703_v40 }
 0x108   : > { %v1728_v13 = vpop.eup %1727  ;;  %969 = vmatmul.f32.gmra.mxu0 %v916_v61  ;;  %1125 = vperm.xlu1 %1698, %v2478_v39   ;;  %v780_v1 = vpop.permute.xlu1 %779 }
 0x109   : > { %v1179_v15 = vmul.f32 %v1728_v13, %v1147_v16  ;;  %1034 = vmatmul.f32.gmra.mxu1 %v734_v33  ;;  %v837_v60 = vadd.f32 %v2436_v49, %v780_v1  ;;  %v897_v31 = vsub.f32 2.0, %v881_v3  ;;  %v1730_v16 = vpop.eup %1729  ;;  %1589 = vmatpush.msrb.mxu3 %v2397_v45  ;;  %v2757_v45 = vld [vmem:[#allocation3_spill] sm:$0xff] }
 0x10a   : > { %1701 = vset.pattern.permute.xlu2 %v2753_v44  ;;  %v735_v44 = vmul.f32 %v719_v2, %v1973_v18  ;;  %v882_v51 = vmul.f32 %v1730_v16, %v850_v9  ;;  %v1228_v33 = vmul.f32 %v1212_v5, %v2757_v45 }
 0x10b   : > { %v1195_v17 = vsub.f32 2.0, %v1179_v15  ;;  %1735 = vrcp.f32 %v837_v60  ;;  %v640_v55 = vpop.permute.xlu2 %639  ;;  %1141 = vperm.xlu2 %1701, %v2189_v25   ;;  %v1732_v48 = vpop.eup %1731  ;;  %v913_v0 = vmul.f32 %v1726_v41, %v897_v31  ;;  %1590 = vmatpush.msra.mxu3 %v2213_v22  ;;  %v2759_v31 = vld [vmem:[#allocation4_spill] sm:$0xff] }
 0x10c   : > { %v1734_v25 = vpop.eup %1733  ;;  %v1181_v19 = vmul.f32 %v1732_v48, %v1149_v37  ;;  %v898_v52 = vsub.f32 2.0, %v882_v51  ;;  %v666_v41 = vadd.f32 %v2426_v58, %v640_v55 }
 0x10d   : > { %v1211_v42 = vmul.f32 %v1728_v13, %v1195_v17  ;;  %v929_v62 = vmul.f32 %v913_v0, %v2756_v10  ;;  %v870_v56 = vmul.f32 %v1734_v25, %v838_v53  ;;  %1591 = vmatpush.msra.mxu3 %v2222_v7  ;;  %v2758_v17 = vld [vmem:[#allocation13_spill] sm:$0xff] }
 0x10e   : > { %v595_v38 = vpop.permute.xlu0 %594  ;;  %v1197_v37 = vsub.f32 2.0, %v1181_v19 }
 0x10f   : > { %1005 = vmatmul.f32.gmra.mxu3 %v928_v50  ;;  %v1227_v26 = vmul.f32 %v1211_v42, %v1973_v18  ;;  %v657_v63 = vadd.f32 %v2426_v58, %v595_v38  ;;  %v886_v3 = vsub.f32 2.0, %v870_v56  ;;  %v840_v42 = vadd.f32 %v2436_v49, %v2482_v46 }
 0x110   : > { %1702 = vset.pattern.permute.xlu1 %v2754_v24  ;;  %1592 = vmatpush.msra.mxu3 %v2233_v11  ;;  %v1213_v1 = vmul.f32 %v1732_v48, %v1197_v37 }
 0x111   : > { %v1736_v36 = vpop.eup %1735  ;;  %1037 = vmatmul.f32.gmra.mxu1 %v735_v44  ;;  %629 = vperm.xlu1 %1702, %v2478_v39   ;;  %v590_v4 = vpop.permute.xlu1 %589  ;;  %1737 = vrcp.f32 %v657_v63  ;;  %v902_v15 = vmul.f32 %v1734_v25, %v886_v3  ;;  %v2763_v3 = vld [vmem:[#allocation5_spill] sm:$0xff] }
 0x112   : > { %v869_v8 = vmul.f32 %v1736_v36, %v837_v60  ;;  %v656_v14 = vadd.f32 %v2426_v58, %v590_v4  ;;  %1282 = vmatmul.f32.gmra.mxu2 %v1227_v26  ;;  %1593 = vmatpush.msra.mxu3 %v2244_v12  ;;  %v1229_v2 = vmul.f32 %v1213_v1, %v2759_v31 }
 0x113   : > { %v600_v24 = vpop.permute.xlu2 %599  ;;  %1703 = vset.pattern.permute.xlu2 %v2749_v47 }
 0x114   : > { %v885_v9 = vsub.f32 2.0, %v869_v8  ;;  %1739 = vrcp.f32 %v656_v14  ;;  %815 = vperm.xlu2 %1703, %v2478_v39   ;;  %v658_v40 = vadd.f32 %v2426_v58, %v600_v24  ;;  %v914_v39 = vmul.f32 %v1730_v16, %v898_v52  ;;  %1594 = vmatpush.msra.mxu3 %v2254_v27  ;;  %v2760_v52 = vld [vmem:[#allocation29_spill] sm:$0xff] }
 0x115   : > { %1741 = vrcp.f32 %v666_v41  ;;  %v918_v16 = vmul.f32 %v902_v15, %v2757_v45 }
 0x116   : > { %v901_v61 = vmul.f32 %v1736_v36, %v885_v9  ;;  %1743 = vrcp.f32 %v658_v40  ;;  %v930_v11 = vmul.f32 %v914_v39, %v2758_v17  ;;  %1595 = vmatpush.msra.mxu3 %v2270_v6  ;;  %v650_v9 = vpop.permute.xlu0 %649 }
 0x117   : > { %1008 = vmatmul.f32.gmra.mxu3 %v929_v62  ;;  %v1738_v47 = vpop.eup %1737  ;;  %v668_v39 = vadd.f32 %v2426_v58, %v650_v9 }
 0x118   : > { %v917_v22 = vmul.f32 %v901_v61, %v1973_v18  ;;  %v689_v34 = vmul.f32 %v1738_v47, %v657_v63  ;;  %1596 = vmatpush.msra.mxu3 %v2283_v23 }
 0x119   : > { %v635_v53 = vpop.permute.xlu1 %634 }
 0x11a   : > { %v1740_v13 = vpop.eup %1739  ;;  %v665_v7 = vadd.f32 %v2426_v58, %v635_v53  ;;  %972 = vmatmul.f32.gmra.mxu0 %v917_v22  ;;  %1285 = vmatmul.f32.gmra.mxu2 %v1228_v33  ;;  %v705_v55 = vsub.f32 2.0, %v689_v34 }
 0x11b   : > { %v688_v57 = vmul.f32 %v1740_v13, %v656_v14  ;;  %v1742_v50 = vpop.eup %1741  ;;  %1597 = vmatpush.msra.mxu3 %v2295_v30 }
 0x11c   : > { %1745 = vrcp.f32 %v665_v7  ;;  %v1106_v60 = vpop.permute.xlu2 %1105  ;;  %v1744_v12 = vpop.eup %1743  ;;  %v721_v0 = vmul.f32 %v1738_v47, %v705_v55  ;;  %v698_v46 = vmul.f32 %v1742_v50, %v666_v41  ;;  %v2764_v55 = vld [vmem:[#allocation32_spill] sm:$0xff] }
 0x11d   : > { %v704_v18 = vsub.f32 2.0, %v688_v57  ;;  %1747 = vrcp.f32 %v840_v42  ;;  %v690_v25 = vmul.f32 %v1744_v12, %v658_v40  ;;  %1598 = vmatpush.msra.mxu3 %v2308_v20  ;;  %v1151_v19 = vadd.f32 %v2423_v59, %v1106_v60  ;;  %v2762_v40 = vld [vmem:[#allocation31_spill] sm:$0xff] }
 0x11e   : > { %v737_v36 = vmul.f32 %v721_v0, %v2759_v31  ;;  %v714_v5 = vsub.f32 2.0, %v698_v46 }
 0x11f   : > { %1011 = vmatmul.f32.gmra.mxu3 %v930_v11  ;;  %v720_v54 = vmul.f32 %v1740_v13, %v704_v18  ;;  %v706_v8 = vsub.f32 2.0, %v690_v25 }
 0x120   : > { %1599 = vmatpush.msra.mxu3 %v2320_v21  ;;  %v730_v37 = vmul.f32 %v1742_v50, %v714_v5  ;;  %v2761_v21 = vld [vmem:[#allocation30_spill] sm:$0xff] }
 0x121   : > { %v736_v38 = vmul.f32 %v720_v54, %v2757_v45  ;;  %v722_v20 = vmul.f32 %v1744_v12, %v706_v8 }
 0x122   : > { %v1746_v48 = vpop.eup %1745  ;;  %975 = vmatmul.f32.gmra.mxu0 %v918_v16  ;;  %v788_v44 = vpop.permute.xlu1 %787  ;;  %1288 = vmatmul.f32.gmra.mxu2 %v1229_v2  ;;  %v746_v53 = vmul.f32 %v730_v37, %v2000_v29 }
 0x123   : > { %v697_v27 = vmul.f32 %v1746_v48, %v665_v7  ;;  %v839_v26 = vadd.f32 %v2436_v49, %v788_v44  ;;  %1040 = vmatmul.f32.gmra.mxu1 %v736_v38  ;;  %v1748_v14 = vpop.eup %1747  ;;  %1600 = vmatpush.msra.mxu3 %v2760_v52  ;;  %v738_v22 = vmul.f32 %v722_v20, %v2763_v3  ;;  %v1130_v2 = vpop.permute.xlu0 %1129 }
 0x124   : > { %v872_v41 = vmul.f32 %v1748_v14, %v840_v42  ;;  %v1157_v16 = vadd.f32 %v2423_v59, %v1130_v2 }
 0x125   : > { %v713_v63 = vsub.f32 2.0, %v697_v27  ;;  %1749 = vrcp.f32 %v839_v26  ;;  %v796_v6 = vpop.permute.xlu2 %795  ;;  %1601 = vmatpush.msra.mxu3 %v2761_v21 }
 0x126   : > { %v841_v4 = vadd.f32 %v2436_v49, %v796_v6  ;;  %v888_v13 = vsub.f32 2.0, %v872_v41 }
 0x127   : > { %v729_v51 = vmul.f32 %v1746_v48, %v713_v63  ;;  %1602 = vmatpush.msra.mxu3 %v2762_v40 }
 0x128   : > { %1751 = vrcp.f32 %v841_v4  ;;  %v904_v11 = vmul.f32 %v1748_v14, %v888_v13 }
 0x129   : > { %v745_v23 = vmul.f32 %v729_v51, %v1998_v28  ;;  %1753 = vrcp.f32 %v1151_v19  ;;  %1603 = vmatpush.msra.mxu3 %v2377_v35 }
 0x12b   : > { %v1750_v62 = vpop.eup %1749  ;;  %v1102_v24 = vpop.permute.xlu1 %1101  ;;  %1043 = vmatmul.f32.gmra.mxu1 %v737_v36  ;;  %1067 = vmatmul.f32.vlgmr.msrb.gmra.mxu3 %v745_v23 }
 0x12c   : > { %v871_v30 = vmul.f32 %v1750_v62, %v839_v26  ;;  %v1150_v56 = vadd.f32 %v2423_v59, %v1102_v24  ;;  %1604 = vmatpush.msra.mxu3 %v2390_v32  ;;  %v920_v32 = vmul.f32 %v904_v11, %v2763_v3  ;;  %v620_v2 = vpop.permute.xlu0 %619 }
 0x12e   : > { %v887_v61 = vsub.f32 2.0, %v871_v30  ;;  %1755 = vrcp.f32 %v1150_v56  ;;  %v610_v45 = vpop.permute.xlu2 %609  ;;  %v1752_v47 = vpop.eup %1751  ;;  %1605 = vmatpush.msra.mxu3 %v2764_v55 }
 0x12f   : > { %v1754_v1 = vpop.eup %1753  ;;  %v873_v34 = vmul.f32 %v1752_v47, %v841_v4  ;;  %1757 = vrcp.f32 %v668_v39  ;;  %v660_v12 = vadd.f32 %v2426_v58, %v610_v45  ;;  %v2765_v4 = vld [vmem:[#allocation6_spill] sm:$0xff] }
 0x130   : > { %v903_v33 = vmul.f32 %v1750_v62, %v887_v61 }
 0x131   : > { %v889_v50 = vsub.f32 2.0, %v873_v34 }
 0x132   : > { %v919_v7 = vmul.f32 %v903_v33, %v2759_v31  ;;  %v1183_v31 = vmul.f32 %v1754_v1, %v1151_v19 }
 0x133   : > { %1046 = vmatmul.f32.gmra.mxu1 %v738_v22  ;;  %1070 = vmatmul.f32.gmra.mxu3 %v746_v53  ;;  %v905_v26 = vmul.f32 %v1752_v47, %v889_v50  ;;  %v2766_v50 = vld [vmem:[#allocation7_spill] sm:$0xff] }
 0x134   : > { %v1756_v57 = vpop.eup %1755  ;;  %978 = vmatmul.f32.gmra.mxu0 %v919_v7  ;;  %v645_v15 = vpop.permute.xlu1 %644  ;;  %v1199_v48 = vsub.f32 2.0, %v1183_v31 }
 0x135   : > { %v1182_v60 = vmul.f32 %v1756_v57, %v1150_v56  ;;  %v667_v18 = vadd.f32 %v2426_v58, %v645_v15  ;;  %v1758_v38 = vpop.eup %1757  ;;  %v921_v5 = vmul.f32 %v905_v26, %v2765_v4 }
 0x136   : > { %v700_v25 = vmul.f32 %v1758_v38, %v668_v39  ;;  %v1215_v6 = vmul.f32 %v1754_v1, %v1199_v48 }
 0x137   : > { %v1198_v54 = vsub.f32 2.0, %v1182_v60  ;;  %1759 = vrcp.f32 %v667_v18  ;;  %v1114_v35 = vpop.permute.xlu2 %1113 }
 0x138   : > { %1761 = vrcp.f32 %v1157_v16  ;;  %v716_v8 = vsub.f32 2.0, %v700_v25  ;;  %v1153_v14 = vadd.f32 %v2423_v59, %v1114_v35  ;;  %v1231_v62 = vmul.f32 %v1215_v6, %v2765_v4 }
 0x139   : > { %v1214_v42 = vmul.f32 %v1756_v57, %v1198_v54  ;;  %1763 = vrcp.f32 %v660_v12 }
 0x13a   : > { %v732_v41 = vmul.f32 %v1758_v38, %v716_v8 }
 0x13b   : > { %v1230_v44 = vmul.f32 %v1214_v42, %v2763_v3 }
 0x13c   : > { %v605_v27 = vpop.permute.xlu1 %604  ;;  %981 = vmatmul.f32.gmra.mxu0 %v920_v32  ;;  %v748_v3 = vmul.f32 %v732_v41, %v2758_v17 }
 0x13d   : > { %v1760_v0 = vpop.eup %1759  ;;  %v659_v46 = vadd.f32 %v2426_v58, %v605_v27  ;;  %1291 = vmatmul.f32.gmra.mxu2 %v1230_v44 }
 0x13e   : > { %v699_v63 = vmul.f32 %v1760_v0, %v667_v18  ;;  %v1762_v23 = vpop.eup %1761 }
 0x13f   : > { %1765 = vrcp.f32 %v659_v46  ;;  %v1764_v24 = vpop.eup %1763  ;;  %v1189_v20 = vmul.f32 %v1762_v23, %v1157_v16 }
 0x140   : > { %v715_v36 = vsub.f32 2.0, %v699_v63  ;;  %v804_v51 = vpop.permute.xlu2 %803  ;;  %1767 = vrcp.f32 %v1153_v14  ;;  %v692_v61 = vmul.f32 %v1764_v24, %v660_v12  ;;  %v662_v12 = vadd.f32 %v2426_v58, %v620_v2 }
 0x141   : > { %v1205_v33 = vsub.f32 2.0, %v1189_v20  ;;  %v843_v53 = vadd.f32 %v2436_v49, %v804_v51 }
 0x142   : > { %v731_v19 = vmul.f32 %v1760_v0, %v715_v36  ;;  %v708_v22 = vsub.f32 2.0, %v692_v61 }
 0x143   : > { %v1221_v1 = vmul.f32 %v1762_v23, %v1205_v33 }
 0x144   : > { %v747_v30 = vmul.f32 %v731_v19, %v2756_v10  ;;  %984 = vmatmul.f32.gmra.mxu0 %v921_v5  ;;  %v724_v60 = vmul.f32 %v1764_v24, %v708_v22  ;;  %v2767_v5 = vld [vmem:[#allocation8_spill] sm:$0xff] }
 0x145   : > { %v1766_v56 = vpop.eup %1765  ;;  %v1110_v9 = vpop.permute.xlu1 %1109  ;;  %1294 = vmatmul.f32.gmra.mxu2 %v1231_v62  ;;  %v1237_v31 = vmul.f32 %v1221_v1, %v1998_v28 }
 0x146   : > { %v691_v52 = vmul.f32 %v1766_v56, %v659_v46  ;;  %v1152_v37 = vadd.f32 %v2423_v59, %v1110_v9  ;;  %1073 = vmatmul.f32.gmra.mxu3 %v747_v30  ;;  %v1768_v13 = vpop.eup %1767  ;;  %v740_v42 = vmul.f32 %v724_v60, %v2766_v50 }
 0x147   : > { %v1185_v18 = vmul.f32 %v1768_v13, %v1153_v14 }
 0x148   : > { %v707_v45 = vsub.f32 2.0, %v691_v52  ;;  %1769 = vrcp.f32 %v1152_v37  ;;  %v812_v41 = vpop.permute.xlu0 %811 }
 0x149   : > { %v1134_v21 = vpop.permute.xlu2 %1133  ;;  %v1201_v32 = vsub.f32 2.0, %v1185_v18  ;;  %v2768_v18 = vld [vmem:[#allocation9_spill] sm:$0xff] }
 0x14a   : > { %v1158_v40 = vadd.f32 %v2423_v59, %v1134_v21  ;;  %v723_v47 = vmul.f32 %v1766_v56, %v707_v45 }
 0x14b   : > { %v1217_v63 = vmul.f32 %v1768_v13, %v1201_v32 }
 0x14c   : > { %1771 = vrcp.f32 %v1158_v40  ;;  %v739_v39 = vmul.f32 %v723_v47, %v2765_v4  ;;  %v845_v47 = vadd.f32 %v2436_v49, %v812_v41  ;;  %v1341_v41 = vld [vmem:[%s2007_s7] sm:$0xff] }
 0x14d   : > { %1773 = vrcp.f32 %v843_v53  ;;  %v1233_v8 = vmul.f32 %v1217_v63, %v2767_v5 }
 0x14e   : > { %v1770_v7 = vpop.eup %1769  ;;  %v800_v57 = vpop.permute.xlu1 %799  ;;  %1049 = vmatmul.f32.gmra.mxu1 %v739_v39  ;;  %1076 = vmatmul.f32.gmra.mxu3 %v748_v3 }
 0x14f   : > { %v1184_v34 = vmul.f32 %v1770_v7, %v1152_v37  ;;  %v842_v15 = vadd.f32 %v2436_v49, %v800_v57 }
 0x151   : > { %v1200_v11 = vsub.f32 2.0, %v1184_v34  ;;  %1775 = vrcp.f32 %v842_v15 }
 0x152   : > { %v1772_v55 = vpop.eup %1771  ;;  %v1122_v16 = vpop.permute.xlu2 %1121  ;;  %1777 = vrcp.f32 %v662_v12 }
 0x153   : > { %v1190_v54 = vmul.f32 %v1772_v55, %v1158_v40  ;;  %v1216_v35 = vmul.f32 %v1770_v7, %v1200_v11  ;;  %v1774_v44 = vpop.eup %1773  ;;  %v1155_v62 = vadd.f32 %v2423_v59, %v1122_v16 }
 0x154   : > { %v875_v25 = vmul.f32 %v1774_v44, %v843_v53 }
 0x155   : > { %v1206_v38 = vsub.f32 2.0, %v1190_v54  ;;  %v1232_v48 = vmul.f32 %v1216_v35, %v2766_v50 }
 0x156   : > { %1052 = vmatmul.f32.gmra.mxu1 %v740_v42  ;;  %1312 = vmatmul.f32.vlgmr.msra.gmra.mxu3 %v1237_v31  ;;  %v891_v14 = vsub.f32 2.0, %v875_v25 }
 0x157   : > { %v1776_v27 = vpop.eup %1775  ;;  %v615_v26 = vpop.permute.xlu1 %614  ;;  %1297 = vmatmul.f32.gmra.mxu2 %v1232_v48  ;;  %v1222_v0 = vmul.f32 %v1772_v55, %v1206_v38 }
 0x158   : > { %v874_v46 = vmul.f32 %v1776_v27, %v842_v15  ;;  %v661_v28 = vadd.f32 %v2426_v58, %v615_v26  ;;  %v1778_v23 = vpop.eup %1777  ;;  %v907_v20 = vmul.f32 %v1774_v44, %v891_v14 }
 0x159   : > { %v1238_v36 = vmul.f32 %v1222_v0, %v2000_v29  ;;  %v694_v52 = vmul.f32 %v1778_v23, %v662_v12 }
 0x15a   : > { %v890_v6 = vsub.f32 2.0, %v874_v46  ;;  %1779 = vrcp.f32 %v661_v28  ;;  %v923_v40 = vmul.f32 %v907_v20, %v2767_v5 }
 0x15b   : > { %v710_v61 = vsub.f32 2.0, %v694_v52 }
 0x15c   : > { %v906_v51 = vmul.f32 %v1776_v27, %v890_v6  ;;  %v625_v4 = vpop.permute.xlu2 %624 }
 0x15d   : > { %v663_v19 = vadd.f32 %v2426_v58, %v625_v4  ;;  %v726_v7 = vmul.f32 %v1778_v23, %v710_v61  ;;  %v2770_v61 = vld [vmem:[#allocation14_spill] sm:$0xff] }
 0x15e   : > { %1315 = vmatmul.f32.gmra.mxu3 %v1238_v36  ;;  %v922_v24 = vmul.f32 %v906_v51, %v2766_v50 }
 0x15f   : > { %1300 = vmatmul.f32.gmra.mxu2 %v1233_v8  ;;  %1781 = vrcp.f32 %v663_v19  ;;  %v742_v11 = vmul.f32 %v726_v7, %v2768_v18 }
 0x160   : > { %v1780_v30 = vpop.eup %1779  ;;  %v1118_v56 = vpop.permute.xlu1 %1117  ;;  %987 = vmatmul.f32.gmra.mxu0 %v922_v24  ;;  %1783 = vrcp.f32 %v1155_v62 }
 0x161   : > { %v693_v9 = vmul.f32 %v1780_v30, %v661_v28  ;;  %v1154_v29 = vadd.f32 %v2423_v59, %v1118_v56 }
 0x163   : > { %v709_v37 = vsub.f32 2.0, %v693_v9  ;;  %1785 = vrcp.f32 %v1154_v29 }
 0x164   : > { %1787 = vrcp.f32 %v845_v47 }
 0x165   : > { %v725_v45 = vmul.f32 %v1780_v30, %v709_v37  ;;  %v1142_v21 = vpop.permute.xlu2 %1141  ;;  %v1782_v33 = vpop.eup %1781 }
 0x166   : > { %v1784_v22 = vpop.eup %1783  ;;  %v695_v13 = vmul.f32 %v1782_v33, %v663_v19  ;;  %v1160_v42 = vadd.f32 %v2423_v59, %v1142_v21 }
 0x167   : > { %v741_v3 = vmul.f32 %v725_v45, %v2767_v5  ;;  %v1187_v34 = vmul.f32 %v1784_v22, %v1155_v62 }
 0x168   : > { %990 = vmatmul.f32.gmra.mxu0 %v923_v40  ;;  %v711_v60 = vsub.f32 2.0, %v695_v13 }
 0x169   : > { %v1786_v53 = vpop.eup %1785  ;;  %v808_v39 = vpop.permute.xlu1 %807  ;;  %1055 = vmatmul.f32.gmra.mxu1 %v741_v3  ;;  %v1203_v35 = vsub.f32 2.0, %v1187_v34 }
 0x16a   : > { %v1186_v1 = vmul.f32 %v1786_v53, %v1154_v29  ;;  %v844_v57 = vadd.f32 %v2436_v49, %v808_v39  ;;  %v1788_v54 = vpop.eup %1787  ;;  %v727_v16 = vmul.f32 %v1782_v33, %v711_v60 }
 0x16b   : > { %v877_v48 = vmul.f32 %v1788_v54, %v845_v47  ;;  %v1219_v27 = vmul.f32 %v1784_v22, %v1203_v35 }
 0x16c   : > { %v1202_v15 = vsub.f32 2.0, %v1186_v1  ;;  %1789 = vrcp.f32 %v844_v57 }
 0x16d   : > { %v893_v46 = vsub.f32 2.0, %v877_v48 }
 0x16e   : > { %v1218_v2 = vmul.f32 %v1786_v53, %v1202_v15  ;;  %v816_v55 = vpop.permute.xlu2 %815 }
 0x16f   : > { %v846_v31 = vadd.f32 %v2436_v49, %v816_v55  ;;  %v2769_v49 = vld [vmem:[#allocation10_spill] sm:$0xff]  ;;  %v909_v19 = vmul.f32 %v1788_v54, %v893_v46  ;;  %v2772_v55 = vld [vmem:[#allocation15_spill] sm:$0xff] }
 0x170   : > { %v1234_v50 = vmul.f32 %v1218_v2, %v2768_v18  ;;  %v743_v0 = vmul.f32 %v727_v16, %v2769_v49  ;;  %v1235_v25 = vmul.f32 %v1219_v27, %v2769_v49 }
 0x171   : > { %1058 = vmatmul.f32.gmra.mxu1 %v742_v11  ;;  %1791 = vrcp.f32 %v846_v31  ;;  %v925_v52 = vmul.f32 %v909_v19, %v2769_v49  ;;  %v1342_v11 = vld [vmem:[%s2007_s7 + $0x8] sm:$0xff]  ;;  %v1343_v49 = vld [vmem:[%s2007_s7 + $0x10] sm:$0xff] }
 0x172   : > { %v1790_v12 = vpop.eup %1789  ;;  %v1138_v32 = vpop.permute.xlu1 %1137  ;;  %1303 = vmatmul.f32.gmra.mxu2 %v1234_v50  ;;  %1793 = vrcp.f32 %v1160_v42 }
 0x173   : > { %v876_v38 = vmul.f32 %v1790_v12, %v844_v57  ;;  %v1159_v44 = vadd.f32 %v2423_v59, %v1138_v32  ;;  %v1032_v14 = vpop.f32.mrf.mxu1 }
 0x175   : > { %v892_v26 = vsub.f32 2.0, %v876_v38  ;;  %1795 = vrcp.f32 %v1159_v44 }
 0x177   : > { %v908_v28 = vmul.f32 %v1790_v12, %v892_v26  ;;  %v1792_v63 = vpop.eup %1791 }
 0x178   : > { %v1794_v36 = vpop.eup %1793  ;;  %v878_v8 = vmul.f32 %v1792_v63, %v846_v31 }
 0x179   : > { %v924_v6 = vmul.f32 %v908_v28, %v2768_v18  ;;  %1061 = vmatmul.f32.gmra.mxu1 %v743_v0  ;;  %v1192_v30 = vmul.f32 %v1794_v36, %v1160_v42  ;;  %v2773_v0 = vld [vmem:[#allocation16_spill] sm:$0xff] }
 0x17a   : > { %v1126_v51 = vpop.permute.xlu1 %1125  ;;  %1306 = vmatmul.f32.gmra.mxu2 %v1235_v25  ;;  %v1277_v56 = vpop.f32.mrf.mxu2  ;;  %v894_v29 = vsub.f32 2.0, %v878_v8  ;;  %v2774_v8 = vld [vmem:[#allocation17_spill] sm:$0xff] }
 0x17b   : > { %v1796_v4 = vpop.eup %1795  ;;  %v1156_v5 = vadd.f32 %v2423_v59, %v1126_v51  ;;  %993 = vmatmul.f32.gmra.mxu0 %v924_v6  ;;  %v1208_v59 = vsub.f32 2.0, %v1192_v30 }
 0x17c   : > { %v1191_v23 = vmul.f32 %v1796_v4, %v1159_v44  ;;  %v910_v47 = vmul.f32 %v1792_v63, %v894_v29  ;;  %v1345_v29 = vld [vmem:[%s2007_s7 + $0x20] sm:$0xff] }
 0x17d   : > { %1797 = vrcp.f32 %v1156_v5  ;;  %v967_v62 = vpop.f32.mrf.mxu0  ;;  %v1224_v1 = vmul.f32 %v1794_v36, %v1208_v59 }
 0x17e   : > { %v1207_v24 = vsub.f32 2.0, %v1191_v23  ;;  %v1033_v9 = vadd.f32 %v1032_v14, %v967_v62 }
 0x180   : > { %v1325_v20 = vadd.f32 %v1277_v56, %v1033_v9  ;;  %v1223_v37 = vmul.f32 %v1796_v4, %v1207_v24  ;;  %v1344_v4 = vld [vmem:[%s2007_s7 + $0x18] sm:$0xff] }
 0x182   : > { %v1357_v45 = vmul.f32 %v1325_v20, %v2770_v61  ;;  %v1239_v21 = vmul.f32 %v1223_v37, %v2756_v10  ;;  %v2771_v10 = vld [vmem:[#allocation11_spill] sm:$0xff]  ;;  %v1280_v15 = vpop.f32.mrf.mxu2 }
 0x183   : > { %v1798_v33 = vpop.eup %1797  ;;  %v630_v40 = vpop.permute.xlu1 %629  ;;  %996 = vmatmul.f32.gmra.mxu0 %v925_v52  ;;  %v926_v34 = vmul.f32 %v910_v47, %v2771_v10  ;;  %v2775_v52 = vld [vmem:[#allocation18_spill] sm:$0xff]  ;;  %v1346_v47 = vld [vmem:[%s2007_s7 + $0x28] sm:$0xff] }
 0x184   : > { %v1188_v3 = vmul.f32 %v1798_v33, %v1156_v5  ;;  %v1373_v22 = vadd.f32 %v1357_v45, %v1341_v41  ;;  %v664_v53 = vadd.f32 %v2426_v58, %v630_v40  ;;  %1318 = vmatmul.f32.gmra.mxu3 %v1239_v21  ;;  %v1240_v58 = vmul.f32 %v1224_v1, %v2758_v17 }
 0x185   : > { %v970_v39 = vpop.f32.mrf.mxu0 }
 0x186   : > { %v1204_v13 = vsub.f32 2.0, %v1188_v3  ;;  %1390 = vst.msk [vmem:[%s2007_s7] sm:$0xff] %vm1389_vm4, %v1373_v22  ;;  %1799 = vrcp.f32 %v664_v53  ;;  %v1035_v7 = vpop.f32.mrf.mxu1  ;;  %v2776_v3 = vld [vmem:[#allocation19_spill] sm:$0xff] }
 0x187   : > { %v1036_v57 = vadd.f32 %v1035_v7, %v970_v39 }
 0x188   : > { %v1220_v60 = vmul.f32 %v1798_v33, %v1204_v13 }
 0x189   : > { %v1326_v18 = vadd.f32 %v1280_v15, %v1036_v57  ;;  %v2777_v15 = vld [vmem:[#allocation20_spill] sm:$0xff] }
 0x18a   : > { %v1236_v2 = vmul.f32 %v1220_v60, %v2771_v10  ;;  %v1003_v16 = vpop.f32.mrf.mxu3 }
 0x18b   : > { %v1358_v31 = vmul.f32 %v1326_v18, %v2772_v55  ;;  %999 = vmatmul.f32.gmra.mxu0 %v926_v34  ;;  %v1347_v34 = vld [vmem:[%s2007_s7 + $0x30] sm:$0xff] }
 0x18c   : > { %v1800_v54 = vpop.eup %1799  ;;  %1309 = vmatmul.f32.gmra.mxu2 %v1236_v2  ;;  %1321 = vmatmul.f32.gmra.mxu3 %v1240_v58 }
 0x18d   : > { %v696_v35 = vmul.f32 %v1800_v54, %v664_v53  ;;  %v1374_v50 = vadd.f32 %v1358_v31, %v1342_v11  ;;  %v1353_v31 = vld [vmem:[%s2007_s7 + $0x60] sm:$0xff] }
 0x18e   : > { %v1038_v17 = vpop.f32.mrf.mxu1 }
 0x18f   : > { %v712_v42 = vsub.f32 2.0, %v696_v35  ;;  %1391 = vst.msk [vmem:[%s2007_s7 + $0x8] sm:$0xff] %vm1389_vm4, %v1374_v50 }
 0x191   : > { %v728_v12 = vmul.f32 %v1800_v54, %v712_v42  ;;  %v2778_v54 = vld [vmem:[#allocation25_spill] sm:$0xff] }
 0x192   : > { %v1006_v26 = vpop.f32.mrf.mxu3 }
 0x193   : > { %v744_v32 = vmul.f32 %v728_v12, %v2771_v10 }
 0x195   : > { %1064 = vmatmul.f32.gmra.mxu1 %v744_v32  ;;  %v1283_v44 = vpop.f32.mrf.mxu2 }
 0x197   : > { %v973_v38 = vpop.f32.mrf.mxu0 }
 0x198   : > { %v1039_v48 = vadd.f32 %v1038_v17, %v973_v38 }
 0x19a   : > { %v1327_v27 = vadd.f32 %v1283_v44, %v1039_v48  ;;  %v2604_v5 = vpop.f32.mrf.mxu3  ;;  %v1348_v44 = vld [vmem:[%s2007_s7 + $0x38] sm:$0xff] }
 0x19c   : > { %v1359_v46 = vmul.f32 %v1327_v27, %v2773_v0  ;;  %v2779_v27 = vld [vmem:[#allocation21_spill] sm:$0xff] }
 0x19d   : > { %v1286_v36 = vpop.f32.mrf.mxu2 }
 0x19e   : > { %v1375_v28 = vadd.f32 %v1359_v46, %v1343_v49  ;;  %v1354_v46 = vld [vmem:[%s2007_s7 + $0x68] sm:$0xff] }
 0x19f   : > { %v976_v63 = vpop.f32.mrf.mxu0 }
 0x1a0   : > { %1392 = vst.msk [vmem:[%s2007_s7 + $0x10] sm:$0xff] %vm1389_vm4, %v1375_v28  ;;  %v1041_v25 = vpop.f32.mrf.mxu1 }
 0x1a1   : > { %v1042_v6 = vadd.f32 %v1041_v25, %v976_v63  ;;  %v2780_v63 = vld [vmem:[#allocation26_spill] sm:$0xff] }
 0x1a2   : > { %v2609_v14 = vpop.f32.mrf.mxu3 }
 0x1a3   : > { %v1328_v51 = vadd.f32 %v1286_v36, %v1042_v6 }
 0x1a5   : > { %v1360_v19 = vmul.f32 %v1328_v51, %v2774_v8  ;;  %v1289_v56 = vpop.f32.mrf.mxu2 }
 0x1a7   : > { %v1376_v23 = vadd.f32 %v1360_v19, %v1344_v4  ;;  %v1349_v19 = vld [vmem:[%s2007_s7 + $0x40] sm:$0xff] }
 0x1a8   : > { %v1044_v62 = vpop.f32.mrf.mxu1 }
 0x1a9   : > { %1393 = vst.msk [vmem:[%s2007_s7 + $0x18] sm:$0xff] %vm1389_vm4, %v1376_v23  ;;  %v2781_v23 = vld [vmem:[#allocation22_spill] sm:$0xff] }
 0x1ae   : > { %v1068_v37 = vpop.f32.mrf.mxu3 }
 0x1af   : > { %v1069_v2 = vadd.f32 %v1068_v37, %v1003_v16  ;;  %v2782_v37 = vld [vmem:[#allocation23_spill] sm:$0xff] }
 0x1b0   : > { %v1047_v61 = vpop.f32.mrf.mxu1 }
 0x1b1   : > { %v979_v24 = vpop.f32.mrf.mxu0 }
 0x1b2   : > { %v1045_v30 = vadd.f32 %v1044_v62, %v979_v24 }
 0x1b4   : > { %v1329_v9 = vadd.f32 %v1289_v56, %v1045_v30 }
 0x1b6   : > { %v1361_v20 = vmul.f32 %v1329_v9, %v2775_v52  ;;  %v1071_v33 = vpop.f32.mrf.mxu3 }
 0x1b7   : > { %v1072_v38 = vadd.f32 %v1071_v33, %v1006_v26 }
 0x1b8   : > { %v1377_v41 = vadd.f32 %v1361_v20, %v1345_v29  ;;  %v1350_v20 = vld [vmem:[%s2007_s7 + $0x48] sm:$0xff] }
 0x1b9   : > { %v982_v59 = vpop.f32.mrf.mxu0 }
 0x1ba   : > { %1394 = vst.msk [vmem:[%s2007_s7 + $0x20] sm:$0xff] %vm1389_vm4, %v1377_v41  ;;  %v1048_v45 = vadd.f32 %v1047_v61, %v982_v59 }
 0x1c0   : > { %v1292_v21 = vpop.f32.mrf.mxu2 }
 0x1c1   : > { %v1330_v40 = vadd.f32 %v1292_v21, %v1048_v45  ;;  %v985_v13 = vpop.f32.mrf.mxu0 }
 0x1c3   : > { %v1362_v22 = vmul.f32 %v1330_v40, %v2776_v3  ;;  %v2783_v3 = vld [vmem:[#allocation24_spill] sm:$0xff] }
 0x1c5   : > { %v1378_v53 = vadd.f32 %v1362_v22, %v1346_v47  ;;  %v1351_v47 = vld [vmem:[%s2007_s7 + $0x50] sm:$0xff] }
 0x1c7   : > { %1395 = vst.msk [vmem:[%s2007_s7 + $0x28] sm:$0xff] %vm1389_vm4, %v1378_v53 }
 0x1c8   : > { %v1295_v57 = vpop.f32.mrf.mxu2 }
 0x1c9   : > { %v1074_v39 = vpop.f32.mrf.mxu3 }
 0x1ca   : > { %v1075_v53 = vadd.f32 %v1074_v39, %v2604_v5  ;;  %v2785_v39 = vld [vmem:[#allocation28_spill] sm:$0xff] }
 0x1cb   : > { %v1050_v7 = vpop.f32.mrf.mxu1 }
 0x1cc   : > { %v1051_v1 = vadd.f32 %v1050_v7, %v985_v13 }
 0x1ce   : > { %v1331_v10 = vadd.f32 %v1295_v57, %v1051_v1  ;;  %v1355_v57 = vld [vmem:[%s2007_s7 + $0x70] sm:$0xff] }
 0x1d0   : > { %v1363_v60 = vmul.f32 %v1331_v10, %v2777_v15  ;;  %v2784_v10 = vld [vmem:[#allocation27_spill] sm:$0xff] }
 0x1d1   : > { %v1077_v18 = vpop.f32.mrf.mxu3 }
 0x1d2   : > { %v1379_v11 = vadd.f32 %v1363_v60, %v1347_v34  ;;  %v1078_v60 = vadd.f32 %v1077_v18, %v2609_v14 }
 0x1d3   : > { %v1053_v50 = vpop.f32.mrf.mxu1 }
 0x1d4   : > { %1396 = vst.msk [vmem:[%s2007_s7 + $0x30] sm:$0xff] %vm1389_vm4, %v1379_v11 }
 0x1d9   : > { %v1313_v58 = vpop.f32.mrf.mxu3 }
 0x1da   : > { %v1337_v55 = vadd.f32 %v1313_v58, %v1069_v2  ;;  %v1298_v32 = vpop.f32.mrf.mxu2  ;;  %v1356_v58 = vld [vmem:[%s2007_s7 + $0x78] sm:$0xff] }
 0x1dc   : > { %v1369_v35 = vmul.f32 %v1337_v55, %v2778_v54 }
 0x1dd   : > { %v988_v42 = vpop.f32.mrf.mxu0 }
 0x1de   : > { %v1385_v12 = vadd.f32 %v1369_v35, %v1353_v31  ;;  %v1054_v17 = vadd.f32 %v1053_v50, %v988_v42 }
 0x1e0   : > { %1402 = vst.msk [vmem:[%s2007_s7 + $0x60] sm:$0xff] %vm1389_vm4, %v1385_v12  ;;  %v1332_v48 = vadd.f32 %v1298_v32, %v1054_v17  ;;  %v1352_v12 = vld [vmem:[%s2007_s7 + $0x58] sm:$0xff] }
 0x1e1   : > { %v1316_v16 = vpop.f32.mrf.mxu3 }
 0x1e2   : > { %v1364_v49 = vmul.f32 %v1332_v48, %v2779_v27  ;;  %v1338_v0 = vadd.f32 %v1316_v16, %v1072_v38  ;;  %v1301_v4 = vpop.f32.mrf.mxu2 }
 0x1e4   : > { %v1380_v28 = vadd.f32 %v1364_v49, %v1348_v44  ;;  %v1370_v25 = vmul.f32 %v1338_v0, %v2780_v63 }
 0x1e5   : > { %v991_v6 = vpop.f32.mrf.mxu0 }
 0x1e6   : > { %1397 = vst.msk [vmem:[%s2007_s7 + $0x38] sm:$0xff] %vm1389_vm4, %v1380_v28  ;;  %v1386_v36 = vadd.f32 %v1370_v25, %v1354_v46  ;;  %v1056_v26 = vpop.f32.mrf.mxu1 }
 0x1e7   : > { %v1057_v51 = vadd.f32 %v1056_v26, %v991_v6 }
 0x1e8   : > { %1403 = vst.msk [vmem:[%s2007_s7 + $0x68] sm:$0xff] %vm1389_vm4, %v1386_v36 }
 0x1e9   : > { %v1333_v8 = vadd.f32 %v1301_v4, %v1057_v51 }
 0x1eb   : > { %v1365_v62 = vmul.f32 %v1333_v8, %v2781_v23 }
 0x1ed   : > { %v1381_v24 = vadd.f32 %v1365_v62, %v1349_v19 }
 0x1ee   : > { %v1059_v30 = vpop.f32.mrf.mxu1 }
 0x1ef   : > { %1398 = vst.msk [vmem:[%s2007_s7 + $0x40] sm:$0xff] %vm1389_vm4, %v1381_v24 }
 0x1f5   : > { %v1304_v56 = vpop.f32.mrf.mxu2 }
 0x1f6   : > { %v1062_v61 = vpop.f32.mrf.mxu1 }
 0x1f8   : > { %v994_v9 = vpop.f32.mrf.mxu0 }
 0x1f9   : > { %v1060_v29 = vadd.f32 %v1059_v30, %v994_v9 }
 0x1fb   : > { %v1334_v52 = vadd.f32 %v1304_v56, %v1060_v29 }
 0x1fd   : > { %v1366_v41 = vmul.f32 %v1334_v52, %v2782_v37  ;;  %v1307_v33 = vpop.f32.mrf.mxu2 }
 0x1ff   : > { %v1382_v59 = vadd.f32 %v1366_v41, %v1350_v20 }
 0x200   : > { %v997_v45 = vpop.f32.mrf.mxu0 }
 0x201   : > { %1399 = vst.msk [vmem:[%s2007_s7 + $0x48] sm:$0xff] %vm1389_vm4, %v1382_v59  ;;  %v1063_v21 = vadd.f32 %v1062_v61, %v997_v45 }
 0x203   : > { %v1335_v40 = vadd.f32 %v1307_v33, %v1063_v21 }
 0x205   : > { %v1367_v22 = vmul.f32 %v1335_v40, %v2783_v3 }
 0x207   : > { %v1383_v13 = vadd.f32 %v1367_v22, %v1351_v47  ;;  %v1319_v7 = vpop.f32.mrf.mxu3 }
 0x208   : > { %v1339_v1 = vadd.f32 %v1319_v7, %v1075_v53  ;;  %v1000_v5 = vpop.f32.mrf.mxu0 }
 0x209   : > { %1400 = vst.msk [vmem:[%s2007_s7 + $0x50] sm:$0xff] %vm1389_vm4, %v1383_v13 }
 0x20a   : > { %v1371_v34 = vmul.f32 %v1339_v1, %v2784_v10 }
 0x20c   : > { %v1387_v15 = vadd.f32 %v1371_v34, %v1355_v57 }
 0x20e   : > { %1404 = vst.msk [vmem:[%s2007_s7 + $0x70] sm:$0xff] %vm1389_vm4, %v1387_v15 }
 0x20f   : > { %v1322_v11 = vpop.f32.mrf.mxu3  ;;  %v1310_v35 = vpop.f32.mrf.mxu2 }
 0x210   : > { %v1340_v2 = vadd.f32 %v1322_v11, %v1078_v60 }
 0x212   : > { %v1372_v55 = vmul.f32 %v1340_v2, %v2785_v39  ;;  %v1065_v31 = vpop.f32.mrf.mxu1 }
 0x213   : > { %v1066_v54 = vadd.f32 %v1065_v31, %v1000_v5 }
 0x214   : > { %v1388_v50 = vadd.f32 %v1372_v55, %v1356_v58 }
 0x215   : > { %v1336_v42 = vadd.f32 %v1310_v35, %v1066_v54 }
 0x216   : > { %1405 = vst.msk [vmem:[%s2007_s7 + $0x78] sm:$0xff] %vm1389_vm4, %v1388_v50 }
 0x217   : > { %v1368_v32 = vmul.f32 %v1336_v42, %v2039_v43 }
 0x219   : > { %v1384_v14 = vadd.f32 %v1368_v32, %v1352_v12 }
 0x21b   : > { %1401 = vst.msk [vmem:[%s2007_s7 + $0x58] sm:$0xff] %vm1389_vm4, %v1384_v14 }
 0x21c PF: > { %s14_s21 = sadd.s32 1, %s1855_s21   ;;  %s2786_s15 = smov %s1835_s16 }
 0x21d   : > { %p11_p0 = scmp.ge.s32.totalorder %s14_s21, 6   ;;  %s2787_s16 = smov %s1937_s28 }
 0x21e   : > { %s2788_s17 = smov %s1847_s19  ;;  %s2789_s18 = smov %s1851_s20 }
 0x21f   : > { %s2790_s19 = smov %s2793_s22  ;;  %s2791_s20 = smov %s2797_s23 }
 0x220   :  { %13 = sbr.rel (!%p11_p0) target bundleno = 4 (0x4), region = 122 }

</bundles_post_ra>
